<compile_context>
chip_gen: v5e
topology: v5e:2x2
jax: 0.10.0
libtpu: 0.0.40
codegen_flags: <defaults>
</compile_context>

<pallas_src>
import functools

import jax
import jax.numpy as jnp
from jax import lax
from jax.experimental import pallas as pl
from jax.experimental.pallas import tpu as pltpu

LANE = 128        # lane-dense padding width for the decision-layer output
NEG_INF = -1e30   # additive mask value for non-edges


# ----------------------------------------------------------------------------
# Fused forward kernel
# ----------------------------------------------------------------------------
def make_fused_forward_kernel(n_layers, n_heads, negative_slope=0.2, eps=1e-5):
    def kernel(
        x_ref, ebias_ref, degm_ref, hmexp_ref,
        embed_w_ref, embed_b_ref,
        w_gat_ref, a_l_ref, a_r_ref, gat_b_ref,
        bn1_g_ref, bn1_b_ref,
        ff_w1_ref, ff_b1_ref, ff_w2_ref, ff_b2_ref,
        bn2_g_ref, bn2_b_ref,
        dec_w_ref, dec_b_ref,
        o_ref,
    ):
        f32 = jnp.float32
        bf16 = jnp.bfloat16

        # Hoisted out of the layer loop (loaded / cast once).
        ebias = ebias_ref[...]          # (N, N): 0 on edge j->i, -1e30 on non-edges
        degm = degm_ref[...]            # (N, 1): 1 if node has >=1 incoming edge
        hmexp = hmexp_ref[...]          # (H*N, D): row block hd = head-hd column mask
        hmexp_bf = hmexp.astype(bf16)

        # ---------------- embed layer ----------------
        h = (jnp.dot(x_ref[...].astype(bf16), embed_w_ref[...],
                     preferred_element_type=f32) + embed_b_ref[...])      # (N, D) f32

        # Static unroll over layers (few layers at demo size; static ref indexing).
        for l in range(n_layers):
            # -------- GATConv fc + per-head attention scores --------
            z = jnp.dot(h.astype(bf16), w_gat_ref[l],
                        preferred_element_type=f32)                       # (N, D) f32
            # el[hd, j] = <attn_l[hd], z_j[head hd]>   (source scores)
            # er[i, hd] = <attn_r[hd], z_i[head hd]>   (destination scores)
            el = lax.dot_general(a_l_ref[l], z, (((1,), (1,)), ((), ())),
                                 preferred_element_type=f32)              # (H, N)
            er = jnp.dot(z, a_r_ref[l], preferred_element_type=f32)       # (N, H)

            # Per-head masked softmax numerators; non-edges exp() to exact 0.
            p_blocks = []
            for hd in range(n_heads):
                e = er[:, hd:hd + 1] + el[hd:hd + 1, :]                   # (N, N)
                e = jnp.where(e > 0, e, negative_slope * e)               # LeakyReLU
                e = e + ebias                                             # mask BEFORE max
                m = jnp.max(e, axis=1, keepdims=True)
                p_blocks.append(jnp.exp(e - m))                           # (N, N) f32
            p_cat = jnp.concatenate(p_blocks, axis=1).astype(bf16)        # (N, H*N)

            # One fused MXU contraction over all heads (block-diag head-masked z),
            # plus per-head row sums (broadcast to that head's columns) via the MXU.
            z_stack = (jnp.concatenate([z] * n_heads, axis=0)
                       * hmexp).astype(bf16)                              # (H*N, D)
            agg = jnp.dot(p_cat, z_stack, preferred_element_type=f32)     # (N, D) unnorm.
            ssum = jnp.dot(p_cat, hmexp_bf, preferred_element_type=f32)   # (N, D) sums

            # Normalize AFTER aggregation; zero-in-degree rows fall back to h + bias.
            recip = pl.reciprocal(jnp.maximum(ssum, 1e-20), approx=True) * degm
            h1 = h + gat_b_ref[l] + agg * recip                           # skip + bias

            # -------- BatchNorm1d #1 (training-mode batch stats) --------
            mean1 = jnp.mean(h1, axis=0, keepdims=True)
            var1 = jnp.mean(jnp.square(h1 - mean1), axis=0, keepdims=True)
            hbn = ((h1 - mean1) * lax.rsqrt(var1 + eps) * bn1_g_ref[l]
                   + bn1_b_ref[l])

            # -------- FeedForward (Linear -> ReLU -> Linear) + skip --------
            f1 = jnp.maximum(
                jnp.dot(hbn.astype(bf16), ff_w1_ref[l],
                        preferred_element_type=f32) + ff_b1_ref[l], 0.0)
            f2 = (jnp.dot(f1.astype(bf16), ff_w2_ref[l],
                          preferred_element_type=f32) + ff_b2_ref[l])
            h2 = hbn + f2

            # -------- BatchNorm1d #2 --------
            mean2 = jnp.mean(h2, axis=0, keepdims=True)
            var2 = jnp.mean(jnp.square(h2 - mean2), axis=0, keepdims=True)
            h = ((h2 - mean2) * lax.rsqrt(var2 + eps) * bn2_g_ref[l]
                 + bn2_b_ref[l])

        # -------- decision layer: lane-dense (N, 128) store --------
        o_ref[...] = (jnp.dot(h.astype(bf16), dec_w_ref[...],
                              preferred_element_type=f32) + dec_b_ref[...])

    return kernel


# ----------------------------------------------------------------------------
# Wrapper: everything fits whole in VMEM at these shapes -> no grid
# ----------------------------------------------------------------------------
_VMEM = pl.BlockSpec(memory_space=pltpu.MemorySpace.VMEM)


def model_forward(x, adj, prep, *, n_layers, n_heads, out_dim):
    n = x.shape[0]
    embed_dim = prep["embed_b"].shape[1]
    head_dim = embed_dim // n_heads

    # Additive edge mask and in-degree indicator, built outside the kernel.
    # TODO(synk): at scale, ship the mask in bf16/int8 and expand in-kernel.
    ebias = jnp.where(adj > 0, 0.0, NEG_INF).astype(jnp.float32)          # (N, N)
    degm = (jnp.sum(adj, axis=1, keepdims=True) > 0).astype(jnp.float32)  # (N, 1)
    # (H*N, D) block head mask: row block hd selects head hd's feature columns.
    col_head = jnp.arange(embed_dim) // head_dim
    row_head = jnp.repeat(jnp.arange(n_heads), n)
    hmexp = (row_head[:, None] == col_head[None, :]).astype(jnp.float32)

    kernel = make_fused_forward_kernel(n_layers, n_heads)
    args = (
        x, ebias, degm, hmexp,
        prep["embed_w"], prep["embed_b"],
        prep["w_gat"], prep["a_l"], prep["a_r"], prep["gat_b"],
        prep["bn1_g"], prep["bn1_b"],
        prep["ff_w1"], prep["ff_b1"], prep["ff_w2"], prep["ff_b2"],
        prep["bn2_g"], prep["bn2_b"],
        prep["dec_w"], prep["dec_b"],
    )
    out_pad = pl.pallas_call(
        kernel,
        out_shape=jax.ShapeDtypeStruct((n, LANE), jnp.float32),
        in_specs=[_VMEM] * len(args),
        out_specs=_VMEM,
    )(*args)
    return out_pad[:, :out_dim]


# ----------------------------------------------------------------------------
# Parameter init (shapes follow the PyTorch __init__) and kernel-side prep
# ----------------------------------------------------------------------------
def init_params(key, in_dim, embed_dim, out_dim, n_layers, n_heads, hidden_dim=512):
    head_dim = embed_dim // n_heads

    def dense(k, shape, scale=0.1):
        return (scale * jax.random.normal(k, shape)).astype(jnp.float32)

    keys = jax.random.split(key, 4 + n_layers)
    layers = []
    for l in range(n_layers):
        lk = jax.random.split(keys[4 + l], 7)
        layers.append({
            "w_gat": dense(lk[0], (embed_dim, n_heads * head_dim)),   # GATConv.fc (no bias)
            "attn_l": dense(lk[1], (n_heads, head_dim)),
            "attn_r": dense(lk[2], (n_heads, head_dim)),
            "gat_b": dense(lk[3], (1, n_heads * head_dim)),           # GATConv bias
            "bn1_g": jnp.ones((1, embed_dim), jnp.float32),
            "bn1_b": jnp.zeros((1, embed_dim), jnp.float32),
            "ff_w1": dense(lk[4], (embed_dim, hidden_dim)),
            "ff_b1": dense(lk[5], (1, hidden_dim)),
            "ff_w2": dense(lk[6], (hidden_dim, embed_dim)),
            "ff_b2": jnp.zeros((1, embed_dim), jnp.float32),
            "bn2_g": jnp.ones((1, embed_dim), jnp.float32),
            "bn2_b": jnp.zeros((1, embed_dim), jnp.float32),
        })
    return {
        "embed_w": dense(keys[0], (in_dim, embed_dim)),
        "embed_b": dense(keys[1], (1, embed_dim)),
        "decision_w": dense(keys[2], (embed_dim, out_dim)),
        "decision_b": dense(keys[3], (1, out_dim)),
        "layers": layers,
    }


def prepare_params(params, *, n_heads, out_dim):
    """Stack per-layer weights, build block attention matrices, cast MXU operands to
    bf16, pad the decision layer to a lane-dense 128."""
    layers = params["layers"]
    n_layers = len(layers)
    embed_dim = params["embed_w"].shape[1]
    head_dim = embed_dim // n_heads
    bf16 = jnp.bfloat16

    def stack(name):
        return jnp.stack([lp[name] for lp in layers], axis=0)

    attn_l = stack("attn_l")                                  # (L, H, F)
    attn_r = stack("attn_r")                                  # (L, H, F)
    a_l = jnp.zeros((n_layers, n_heads, embed_dim), jnp.float32)
    a_r = jnp.zeros((n_layers, embed_dim, n_heads), jnp.float32)
    for h in range(n_heads):
        sl = slice(h * head_dim, (h + 1) * head_dim)
        a_l = a_l.at[:, h, sl].set(attn_l[:, h, :])
        a_r = a_r.at[:, sl, h].set(attn_r[:, h, :])

    dec_w = (jnp.zeros((embed_dim, LANE), jnp.float32)
             .at[:, :out_dim].set(params["decision_w"]))
    dec_b = (jnp.zeros((1, LANE), jnp.float32)
             .at[:, :out_dim].set(params["decision_b"]))

    return {
        "embed_w": params["embed_w"].astype(bf16),
        "embed_b": params["embed_b"],
        "w_gat": stack("w_gat").astype(bf16),                  # (L, D, D)
        "a_l": a_l,                                            # (L, H, D)
        "a_r": a_r,                                            # (L, D, H)
        "gat_b": stack("gat_b"),                               # (L, 1, D)
        "bn1_g": stack("bn1_g"), "bn1_b": stack("bn1_b"),
        "ff_w1": stack("ff_w1").astype(bf16),                  # (L, D, 512)
        "ff_b1": stack("ff_b1"),
        "ff_w2": stack("ff_w2").astype(bf16),                  # (L, 512, D)
        "ff_b2": stack("ff_b2"),
        "bn2_g": stack("bn2_g"), "bn2_b": stack("bn2_b"),
        "dec_w": dec_w.astype(bf16),                           # (D, 128) padded
        "dec_b": dec_b,                                        # (1, 128) padded
    }


def build_adjacency(n):
    # deterministic graph: self-loops + ring edges + a few long-range edges
    adj = jnp.zeros((n, n), jnp.float32)
    for i in range(n):
        adj = adj.at[i, i].set(1.0)                    # self-loop
        adj = adj.at[i, (i - 1) % n].set(1.0)          # (i-1) -> i
        adj = adj.at[(i + 3) % n, i].set(1.0)          # i -> (i+3)
    return adj


# ----------------------------------------------------------------------------
if __name__ == "__main__":
    # Small, module-consistent shapes
    N_NODES = 16
    IN_DIM = 8
    EMBED_DIM = 32
    OUT_DIM = 1
    N_LAYERS = 2
    N_HEADS = 2        # embed_dim // n_heads = 16 per-head features
    # hidden_dim is hard-coded to 512 in AttentionLayer; kept as-is.

    key = jax.random.PRNGKey(0)
    k_x, k_p = jax.random.split(key)

    x = jax.random.normal(k_x, (N_NODES, IN_DIM), dtype=jnp.float32)
    adj = build_adjacency(N_NODES)
    params = init_params(k_p, IN_DIM, EMBED_DIM, OUT_DIM, N_LAYERS, N_HEADS)
    prep = prepare_params(params, n_heads=N_HEADS, out_dim=OUT_DIM)

    fwd = jax.jit(functools.partial(
        model_forward, n_layers=N_LAYERS, n_heads=N_HEADS, out_dim=OUT_DIM))
    out = fwd(x, adj, prep)
    jax.block_until_ready(out)

    assert out.shape == (N_NODES, OUT_DIM)
    assert out.dtype == jnp.float32
    assert bool(jnp.all(jnp.isfinite(out)))
    print("KERNEL_OK")
</pallas_src>

<mosaic_0001>
module attributes {stable_mosaic.version = 11 : i64} {
  func.func @kernel(%arg0: memref<16x8xf32, #tpu.memory_space<vmem>>, %arg1: memref<16x16xf32, #tpu.memory_space<vmem>>, %arg2: memref<16x1xf32, #tpu.memory_space<vmem>>, %arg3: memref<32x32xf32, #tpu.memory_space<vmem>>, %arg4: memref<8x32xbf16, #tpu.memory_space<vmem>>, %arg5: memref<1x32xf32, #tpu.memory_space<vmem>>, %arg6: memref<2x32x32xbf16, #tpu.memory_space<vmem>>, %arg7: memref<2x2x32xf32, #tpu.memory_space<vmem>>, %arg8: memref<2x32x2xf32, #tpu.memory_space<vmem>>, %arg9: memref<2x1x32xf32, #tpu.memory_space<vmem>>, %arg10: memref<2x1x32xf32, #tpu.memory_space<vmem>>, %arg11: memref<2x1x32xf32, #tpu.memory_space<vmem>>, %arg12: memref<2x32x512xbf16, #tpu.memory_space<vmem>>, %arg13: memref<2x1x512xf32, #tpu.memory_space<vmem>>, %arg14: memref<2x512x32xbf16, #tpu.memory_space<vmem>>, %arg15: memref<2x1x32xf32, #tpu.memory_space<vmem>>, %arg16: memref<2x1x32xf32, #tpu.memory_space<vmem>>, %arg17: memref<2x1x32xf32, #tpu.memory_space<vmem>>, %arg18: memref<32x128xbf16, #tpu.memory_space<vmem>>, %arg19: memref<1x128xf32, #tpu.memory_space<vmem>>, %arg20: memref<16x128xf32, #tpu.memory_space<vmem>>) attributes {dimension_semantics = [], scalar_prefetch = 0 : i64, scratch_operands = 0 : i64, tpu.core_type = #tpu.core_type<tc>} {
    %c0 = arith.constant 0 : index
    %c0_0 = arith.constant 0 : index
    %0 = vector.load %arg1[%c0, %c0_0] : memref<16x16xf32, #tpu.memory_space<vmem>>, vector<16x16xf32>
    %c0_1 = arith.constant 0 : index
    %c0_2 = arith.constant 0 : index
    %1 = vector.load %arg2[%c0_1, %c0_2] : memref<16x1xf32, #tpu.memory_space<vmem>>, vector<16x1xf32>
    %c0_3 = arith.constant 0 : index
    %c0_4 = arith.constant 0 : index
    %2 = vector.load %arg3[%c0_3, %c0_4] : memref<32x32xf32, #tpu.memory_space<vmem>>, vector<32x32xf32>
    %3 = arith.truncf %2 : vector<32x32xf32> to vector<32x32xbf16>
    %c0_5 = arith.constant 0 : index
    %c0_6 = arith.constant 0 : index
    %4 = vector.load %arg0[%c0_5, %c0_6] : memref<16x8xf32, #tpu.memory_space<vmem>>, vector<16x8xf32>
    %5 = arith.truncf %4 : vector<16x8xf32> to vector<16x8xbf16>
    %c0_7 = arith.constant 0 : index
    %c0_8 = arith.constant 0 : index
    %6 = vector.load %arg4[%c0_7, %c0_8] : memref<8x32xbf16, #tpu.memory_space<vmem>>, vector<8x32xbf16>
    %cst = arith.constant dense<0.000000e+00> : vector<16x32xf32>
    %7 = tpu.matmul %5, %6, %cst {dimension_numbers = #tpu.dot_dimension_numbers<[1], [0], [0], [1], [0, 0, 1, 1], [], []>} : vector<16x8xbf16>, vector<8x32xbf16>, vector<16x32xf32> -> vector<16x32xf32>
    %c0_9 = arith.constant 0 : index
    %c0_10 = arith.constant 0 : index
    %8 = vector.load %arg5[%c0_9, %c0_10] : memref<1x32xf32, #tpu.memory_space<vmem>>, vector<1x32xf32>
    %9 = vector.broadcast %8 : vector<1x32xf32> to vector<16x32xf32>
    %10 = arith.addf %7, %9 : vector<16x32xf32>
    %11 = arith.truncf %10 : vector<16x32xf32> to vector<16x32xbf16>
    %c0_11 = arith.constant 0 : index
    %c0_12 = arith.constant 0 : index
    %c0_13 = arith.constant 0 : index
    %12 = vector.load %arg6[%c0_11, %c0_12, %c0_13] : memref<2x32x32xbf16, #tpu.memory_space<vmem>>, vector<1x32x32xbf16>
    %13 = vector.shape_cast %12 : vector<1x32x32xbf16> to vector<32x32xbf16>
    %cst_14 = arith.constant dense<0.000000e+00> : vector<16x32xf32>
    %14 = tpu.matmul %11, %13, %cst_14 {dimension_numbers = #tpu.dot_dimension_numbers<[1], [0], [0], [1], [0, 0, 1, 1], [], []>} : vector<16x32xbf16>, vector<32x32xbf16>, vector<16x32xf32> -> vector<16x32xf32>
    %c0_15 = arith.constant 0 : index
    %c0_16 = arith.constant 0 : index
    %c0_17 = arith.constant 0 : index
    %15 = vector.load %arg7[%c0_15, %c0_16, %c0_17] : memref<2x2x32xf32, #tpu.memory_space<vmem>>, vector<1x2x32xf32>
    %16 = vector.shape_cast %15 : vector<1x2x32xf32> to vector<2x32xf32>
    %cst_18 = arith.constant dense<0.000000e+00> : vector<2x16xf32>
    %17 = tpu.matmul %16, %14, %cst_18 {dimension_numbers = #tpu.dot_dimension_numbers<[1], [1], [0], [0], [0, 0, 1, 0], [], []>} : vector<2x32xf32>, vector<16x32xf32>, vector<2x16xf32> -> vector<2x16xf32>
    %c0_19 = arith.constant 0 : index
    %c0_20 = arith.constant 0 : index
    %c0_21 = arith.constant 0 : index
    %18 = vector.load %arg8[%c0_19, %c0_20, %c0_21] : memref<2x32x2xf32, #tpu.memory_space<vmem>>, vector<1x32x2xf32>
    %19 = vector.shape_cast %18 : vector<1x32x2xf32> to vector<32x2xf32>
    %cst_22 = arith.constant dense<0.000000e+00> : vector<16x2xf32>
    %20 = tpu.matmul %14, %19, %cst_22 {dimension_numbers = #tpu.dot_dimension_numbers<[1], [0], [0], [1], [0, 0, 1, 1], [], []>} : vector<16x32xf32>, vector<32x2xf32>, vector<16x2xf32> -> vector<16x2xf32>
    %21 = vector.extract_strided_slice %20 {offsets = [0, 0], sizes = [16, 1], strides = [1, 1]} : vector<16x2xf32> to vector<16x1xf32>
    %22 = vector.extract_strided_slice %17 {offsets = [0, 0], sizes = [1, 16], strides = [1, 1]} : vector<2x16xf32> to vector<1x16xf32>
    %23 = vector.broadcast %21 : vector<16x1xf32> to vector<16x16xf32>
    %24 = vector.broadcast %22 : vector<1x16xf32> to vector<16x16xf32>
    %25 = arith.addf %23, %24 : vector<16x16xf32>
    %cst_23 = arith.constant 0.000000e+00 : f32
    %26 = vector.broadcast %cst_23 : f32 to vector<16x16xf32>
    %27 = arith.cmpf ogt, %25, %26 : vector<16x16xf32>
    %cst_24 = arith.constant 2.000000e-01 : f32
    %28 = vector.broadcast %cst_24 : f32 to vector<16x16xf32>
    %29 = arith.mulf %28, %25 : vector<16x16xf32>
    %30 = arith.select %27, %25, %29 : vector<16x16xi1>, vector<16x16xf32>
    %31 = arith.addf %30, %0 : vector<16x16xf32>
    %cst_25 = arith.constant dense<0xFF800000> : vector<16xf32>
    %32 = vector.multi_reduction <maximumf>, %31, %cst_25 [1] : vector<16x16xf32> to vector<16xf32>
    %33 = vector.shape_cast %32 : vector<16xf32> to vector<16x1xf32>
    %34 = vector.broadcast %33 : vector<16x1xf32> to vector<16x16xf32>
    %35 = arith.subf %31, %34 : vector<16x16xf32>
    %36 = math.exp %35 : vector<16x16xf32>
    %37 = vector.extract_strided_slice %20 {offsets = [0, 1], sizes = [16, 1], strides = [1, 1]} : vector<16x2xf32> to vector<16x1xf32>
    %38 = vector.extract_strided_slice %17 {offsets = [1, 0], sizes = [1, 16], strides = [1, 1]} : vector<2x16xf32> to vector<1x16xf32>
    %39 = vector.broadcast %37 : vector<16x1xf32> to vector<16x16xf32>
    %40 = vector.broadcast %38 : vector<1x16xf32> to vector<16x16xf32>
    %41 = arith.addf %39, %40 : vector<16x16xf32>
    %cst_26 = arith.constant 0.000000e+00 : f32
    %42 = vector.broadcast %cst_26 : f32 to vector<16x16xf32>
    %43 = arith.cmpf ogt, %41, %42 : vector<16x16xf32>
    %cst_27 = arith.constant 2.000000e-01 : f32
    %44 = vector.broadcast %cst_27 : f32 to vector<16x16xf32>
    %45 = arith.mulf %44, %41 : vector<16x16xf32>
    %46 = arith.select %43, %41, %45 : vector<16x16xi1>, vector<16x16xf32>
    %47 = arith.addf %46, %0 : vector<16x16xf32>
    %cst_28 = arith.constant dense<0xFF800000> : vector<16xf32>
    %48 = vector.multi_reduction <maximumf>, %47, %cst_28 [1] : vector<16x16xf32> to vector<16xf32>
    %49 = vector.shape_cast %48 : vector<16xf32> to vector<16x1xf32>
    %50 = vector.broadcast %49 : vector<16x1xf32> to vector<16x16xf32>
    %51 = arith.subf %47, %50 : vector<16x16xf32>
    %52 = math.exp %51 : vector<16x16xf32>
    %53 = tpu.concatenate %36, %52 in 1 : vector<16x16xf32>, vector<16x16xf32> -> vector<16x32xf32>
    %54 = arith.truncf %53 : vector<16x32xf32> to vector<16x32xbf16>
    %55 = tpu.concatenate %14, %14 in 0 : vector<16x32xf32>, vector<16x32xf32> -> vector<32x32xf32>
    %56 = arith.mulf %55, %2 : vector<32x32xf32>
    %57 = arith.truncf %56 : vector<32x32xf32> to vector<32x32xbf16>
    %cst_29 = arith.constant dense<0.000000e+00> : vector<16x32xf32>
    %58 = tpu.matmul %54, %57, %cst_29 {dimension_numbers = #tpu.dot_dimension_numbers<[1], [0], [0], [1], [0, 0, 1, 1], [], []>} : vector<16x32xbf16>, vector<32x32xbf16>, vector<16x32xf32> -> vector<16x32xf32>
    %cst_30 = arith.constant dense<0.000000e+00> : vector<16x32xf32>
    %59 = tpu.matmul %54, %3, %cst_30 {dimension_numbers = #tpu.dot_dimension_numbers<[1], [0], [0], [1], [0, 0, 1, 1], [], []>} : vector<16x32xbf16>, vector<32x32xbf16>, vector<16x32xf32> -> vector<16x32xf32>
    %cst_31 = arith.constant 9.99999968E-21 : f32
    %60 = vector.broadcast %cst_31 : f32 to vector<16x32xf32>
    %61 = arith.maximumf %59, %60 : vector<16x32xf32>
    %62 = tpu.reciprocal %61 {approx = true} : vector<16x32xf32> -> vector<16x32xf32>
    %63 = vector.broadcast %1 : vector<16x1xf32> to vector<16x32xf32>
    %64 = arith.mulf %62, %63 : vector<16x32xf32>
    %c0_32 = arith.constant 0 : index
    %c0_33 = arith.constant 0 : index
    %c0_34 = arith.constant 0 : index
    %65 = vector.load %arg9[%c0_32, %c0_33, %c0_34] : memref<2x1x32xf32, #tpu.memory_space<vmem>>, vector<1x1x32xf32>
    %66 = vector.shape_cast %65 : vector<1x1x32xf32> to vector<1x32xf32>
    %67 = vector.broadcast %66 : vector<1x32xf32> to vector<16x32xf32>
    %68 = arith.addf %10, %67 : vector<16x32xf32>
    %69 = arith.mulf %58, %64 : vector<16x32xf32>
    %70 = arith.addf %68, %69 : vector<16x32xf32>
    %cst_35 = arith.constant dense<0.000000e+00> : vector<32xf32>
    %71 = vector.multi_reduction <add>, %70, %cst_35 [0] : vector<16x32xf32> to vector<32xf32>
    %72 = vector.shape_cast %71 : vector<32xf32> to vector<1x32xf32>
    %cst_36 = arith.constant 1.600000e+01 : f32
    %73 = vector.broadcast %cst_36 : f32 to vector<1x32xf32>
    %74 = arith.divf %72, %73 : vector<1x32xf32>
    %75 = vector.broadcast %74 : vector<1x32xf32> to vector<16x32xf32>
    %76 = arith.subf %70, %75 : vector<16x32xf32>
    %77 = arith.mulf %76, %76 : vector<16x32xf32>
    %cst_37 = arith.constant dense<0.000000e+00> : vector<32xf32>
    %78 = vector.multi_reduction <add>, %77, %cst_37 [0] : vector<16x32xf32> to vector<32xf32>
    %79 = vector.shape_cast %78 : vector<32xf32> to vector<1x32xf32>
    %cst_38 = arith.constant 1.600000e+01 : f32
    %80 = vector.broadcast %cst_38 : f32 to vector<1x32xf32>
    %81 = arith.divf %79, %80 : vector<1x32xf32>
    %82 = vector.broadcast %74 : vector<1x32xf32> to vector<16x32xf32>
    %83 = arith.subf %70, %82 : vector<16x32xf32>
    %cst_39 = arith.constant 9.99999974E-6 : f32
    %84 = vector.broadcast %cst_39 : f32 to vector<1x32xf32>
    %85 = arith.addf %81, %84 : vector<1x32xf32>
    %86 = math.rsqrt %85 : vector<1x32xf32>
    %87 = vector.broadcast %86 : vector<1x32xf32> to vector<16x32xf32>
    %88 = arith.mulf %83, %87 : vector<16x32xf32>
    %c0_40 = arith.constant 0 : index
    %c0_41 = arith.constant 0 : index
    %c0_42 = arith.constant 0 : index
    %89 = vector.load %arg10[%c0_40, %c0_41, %c0_42] : memref<2x1x32xf32, #tpu.memory_space<vmem>>, vector<1x1x32xf32>
    %90 = vector.shape_cast %89 : vector<1x1x32xf32> to vector<1x32xf32>
    %91 = vector.broadcast %90 : vector<1x32xf32> to vector<16x32xf32>
    %92 = arith.mulf %88, %91 : vector<16x32xf32>
    %c0_43 = arith.constant 0 : index
    %c0_44 = arith.constant 0 : index
    %c0_45 = arith.constant 0 : index
    %93 = vector.load %arg11[%c0_43, %c0_44, %c0_45] : memref<2x1x32xf32, #tpu.memory_space<vmem>>, vector<1x1x32xf32>
    %94 = vector.shape_cast %93 : vector<1x1x32xf32> to vector<1x32xf32>
    %95 = vector.broadcast %94 : vector<1x32xf32> to vector<16x32xf32>
    %96 = arith.addf %92, %95 : vector<16x32xf32>
    %97 = arith.truncf %96 : vector<16x32xf32> to vector<16x32xbf16>
    %c0_46 = arith.constant 0 : index
    %c0_47 = arith.constant 0 : index
    %c0_48 = arith.constant 0 : index
    %98 = vector.load %arg12[%c0_46, %c0_47, %c0_48] : memref<2x32x512xbf16, #tpu.memory_space<vmem>>, vector<1x32x512xbf16>
    %99 = vector.shape_cast %98 : vector<1x32x512xbf16> to vector<32x512xbf16>
    %cst_49 = arith.constant dense<0.000000e+00> : vector<16x512xf32>
    %100 = tpu.matmul %97, %99, %cst_49 {dimension_numbers = #tpu.dot_dimension_numbers<[1], [0], [0], [1], [0, 0, 1, 1], [], []>} : vector<16x32xbf16>, vector<32x512xbf16>, vector<16x512xf32> -> vector<16x512xf32>
    %c0_50 = arith.constant 0 : index
    %c0_51 = arith.constant 0 : index
    %c0_52 = arith.constant 0 : index
    %101 = vector.load %arg13[%c0_50, %c0_51, %c0_52] : memref<2x1x512xf32, #tpu.memory_space<vmem>>, vector<1x1x512xf32>
    %102 = vector.shape_cast %101 : vector<1x1x512xf32> to vector<1x512xf32>
    %103 = vector.broadcast %102 : vector<1x512xf32> to vector<16x512xf32>
    %104 = arith.addf %100, %103 : vector<16x512xf32>
    %cst_53 = arith.constant 0.000000e+00 : f32
    %105 = vector.broadcast %cst_53 : f32 to vector<16x512xf32>
    %106 = arith.maximumf %104, %105 : vector<16x512xf32>
    %107 = arith.truncf %106 : vector<16x512xf32> to vector<16x512xbf16>
    %c0_54 = arith.constant 0 : index
    %c0_55 = arith.constant 0 : index
    %c0_56 = arith.constant 0 : index
    %108 = vector.load %arg14[%c0_54, %c0_55, %c0_56] : memref<2x512x32xbf16, #tpu.memory_space<vmem>>, vector<1x512x32xbf16>
    %109 = vector.shape_cast %108 : vector<1x512x32xbf16> to vector<512x32xbf16>
    %cst_57 = arith.constant dense<0.000000e+00> : vector<16x32xf32>
    %110 = tpu.matmul %107, %109, %cst_57 {dimension_numbers = #tpu.dot_dimension_numbers<[1], [0], [0], [1], [0, 0, 1, 1], [], []>} : vector<16x512xbf16>, vector<512x32xbf16>, vector<16x32xf32> -> vector<16x32xf32>
    %c0_58 = arith.constant 0 : index
    %c0_59 = arith.constant 0 : index
    %c0_60 = arith.constant 0 : index
    %111 = vector.load %arg15[%c0_58, %c0_59, %c0_60] : memref<2x1x32xf32, #tpu.memory_space<vmem>>, vector<1x1x32xf32>
    %112 = vector.shape_cast %111 : vector<1x1x32xf32> to vector<1x32xf32>
    %113 = vector.broadcast %112 : vector<1x32xf32> to vector<16x32xf32>
    %114 = arith.addf %110, %113 : vector<16x32xf32>
    %115 = arith.addf %96, %114 : vector<16x32xf32>
    %cst_61 = arith.constant dense<0.000000e+00> : vector<32xf32>
    %116 = vector.multi_reduction <add>, %115, %cst_61 [0] : vector<16x32xf32> to vector<32xf32>
    %117 = vector.shape_cast %116 : vector<32xf32> to vector<1x32xf32>
    %cst_62 = arith.constant 1.600000e+01 : f32
    %118 = vector.broadcast %cst_62 : f32 to vector<1x32xf32>
    %119 = arith.divf %117, %118 : vector<1x32xf32>
    %120 = vector.broadcast %119 : vector<1x32xf32> to vector<16x32xf32>
    %121 = arith.subf %115, %120 : vector<16x32xf32>
    %122 = arith.mulf %121, %121 : vector<16x32xf32>
    %cst_63 = arith.constant dense<0.000000e+00> : vector<32xf32>
    %123 = vector.multi_reduction <add>, %122, %cst_63 [0] : vector<16x32xf32> to vector<32xf32>
    %124 = vector.shape_cast %123 : vector<32xf32> to vector<1x32xf32>
    %cst_64 = arith.constant 1.600000e+01 : f32
    %125 = vector.broadcast %cst_64 : f32 to vector<1x32xf32>
    %126 = arith.divf %124, %125 : vector<1x32xf32>
    %127 = vector.broadcast %119 : vector<1x32xf32> to vector<16x32xf32>
    %128 = arith.subf %115, %127 : vector<16x32xf32>
    %cst_65 = arith.constant 9.99999974E-6 : f32
    %129 = vector.broadcast %cst_65 : f32 to vector<1x32xf32>
    %130 = arith.addf %126, %129 : vector<1x32xf32>
    %131 = math.rsqrt %130 : vector<1x32xf32>
    %132 = vector.broadcast %131 : vector<1x32xf32> to vector<16x32xf32>
    %133 = arith.mulf %128, %132 : vector<16x32xf32>
    %c0_66 = arith.constant 0 : index
    %c0_67 = arith.constant 0 : index
    %c0_68 = arith.constant 0 : index
    %134 = vector.load %arg16[%c0_66, %c0_67, %c0_68] : memref<2x1x32xf32, #tpu.memory_space<vmem>>, vector<1x1x32xf32>
    %135 = vector.shape_cast %134 : vector<1x1x32xf32> to vector<1x32xf32>
    %136 = vector.broadcast %135 : vector<1x32xf32> to vector<16x32xf32>
    %137 = arith.mulf %133, %136 : vector<16x32xf32>
    %c0_69 = arith.constant 0 : index
    %c0_70 = arith.constant 0 : index
    %c0_71 = arith.constant 0 : index
    %138 = vector.load %arg17[%c0_69, %c0_70, %c0_71] : memref<2x1x32xf32, #tpu.memory_space<vmem>>, vector<1x1x32xf32>
    %139 = vector.shape_cast %138 : vector<1x1x32xf32> to vector<1x32xf32>
    %140 = vector.broadcast %139 : vector<1x32xf32> to vector<16x32xf32>
    %141 = arith.addf %137, %140 : vector<16x32xf32>
    %142 = arith.truncf %141 : vector<16x32xf32> to vector<16x32xbf16>
    %c1 = arith.constant 1 : index
    %c0_72 = arith.constant 0 : index
    %c0_73 = arith.constant 0 : index
    %143 = vector.load %arg6[%c1, %c0_72, %c0_73] : memref<2x32x32xbf16, #tpu.memory_space<vmem>>, vector<1x32x32xbf16>
    %144 = vector.shape_cast %143 : vector<1x32x32xbf16> to vector<32x32xbf16>
    %cst_74 = arith.constant dense<0.000000e+00> : vector<16x32xf32>
    %145 = tpu.matmul %142, %144, %cst_74 {dimension_numbers = #tpu.dot_dimension_numbers<[1], [0], [0], [1], [0, 0, 1, 1], [], []>} : vector<16x32xbf16>, vector<32x32xbf16>, vector<16x32xf32> -> vector<16x32xf32>
    %c1_75 = arith.constant 1 : index
    %c0_76 = arith.constant 0 : index
    %c0_77 = arith.constant 0 : index
    %146 = vector.load %arg7[%c1_75, %c0_76, %c0_77] : memref<2x2x32xf32, #tpu.memory_space<vmem>>, vector<1x2x32xf32>
    %147 = vector.shape_cast %146 : vector<1x2x32xf32> to vector<2x32xf32>
    %cst_78 = arith.constant dense<0.000000e+00> : vector<2x16xf32>
    %148 = tpu.matmul %147, %145, %cst_78 {dimension_numbers = #tpu.dot_dimension_numbers<[1], [1], [0], [0], [0, 0, 1, 0], [], []>} : vector<2x32xf32>, vector<16x32xf32>, vector<2x16xf32> -> vector<2x16xf32>
    %c1_79 = arith.constant 1 : index
    %c0_80 = arith.constant 0 : index
    %c0_81 = arith.constant 0 : index
    %149 = vector.load %arg8[%c1_79, %c0_80, %c0_81] : memref<2x32x2xf32, #tpu.memory_space<vmem>>, vector<1x32x2xf32>
    %150 = vector.shape_cast %149 : vector<1x32x2xf32> to vector<32x2xf32>
    %cst_82 = arith.constant dense<0.000000e+00> : vector<16x2xf32>
    %151 = tpu.matmul %145, %150, %cst_82 {dimension_numbers = #tpu.dot_dimension_numbers<[1], [0], [0], [1], [0, 0, 1, 1], [], []>} : vector<16x32xf32>, vector<32x2xf32>, vector<16x2xf32> -> vector<16x2xf32>
    %152 = vector.extract_strided_slice %151 {offsets = [0, 0], sizes = [16, 1], strides = [1, 1]} : vector<16x2xf32> to vector<16x1xf32>
    %153 = vector.extract_strided_slice %148 {offsets = [0, 0], sizes = [1, 16], strides = [1, 1]} : vector<2x16xf32> to vector<1x16xf32>
    %154 = vector.broadcast %152 : vector<16x1xf32> to vector<16x16xf32>
    %155 = vector.broadcast %153 : vector<1x16xf32> to vector<16x16xf32>
    %156 = arith.addf %154, %155 : vector<16x16xf32>
    %cst_83 = arith.constant 0.000000e+00 : f32
    %157 = vector.broadcast %cst_83 : f32 to vector<16x16xf32>
    %158 = arith.cmpf ogt, %156, %157 : vector<16x16xf32>
    %cst_84 = arith.constant 2.000000e-01 : f32
    %159 = vector.broadcast %cst_84 : f32 to vector<16x16xf32>
    %160 = arith.mulf %159, %156 : vector<16x16xf32>
    %161 = arith.select %158, %156, %160 : vector<16x16xi1>, vector<16x16xf32>
    %162 = arith.addf %161, %0 : vector<16x16xf32>
    %cst_85 = arith.constant dense<0xFF800000> : vector<16xf32>
    %163 = vector.multi_reduction <maximumf>, %162, %cst_85 [1] : vector<16x16xf32> to vector<16xf32>
    %164 = vector.shape_cast %163 : vector<16xf32> to vector<16x1xf32>
    %165 = vector.broadcast %164 : vector<16x1xf32> to vector<16x16xf32>
    %166 = arith.subf %162, %165 : vector<16x16xf32>
    %167 = math.exp %166 : vector<16x16xf32>
    %168 = vector.extract_strided_slice %151 {offsets = [0, 1], sizes = [16, 1], strides = [1, 1]} : vector<16x2xf32> to vector<16x1xf32>
    %169 = vector.extract_strided_slice %148 {offsets = [1, 0], sizes = [1, 16], strides = [1, 1]} : vector<2x16xf32> to vector<1x16xf32>
    %170 = vector.broadcast %168 : vector<16x1xf32> to vector<16x16xf32>
    %171 = vector.broadcast %169 : vector<1x16xf32> to vector<16x16xf32>
    %172 = arith.addf %170, %171 : vector<16x16xf32>
    %cst_86 = arith.constant 0.000000e+00 : f32
    %173 = vector.broadcast %cst_86 : f32 to vector<16x16xf32>
    %174 = arith.cmpf ogt, %172, %173 : vector<16x16xf32>
    %cst_87 = arith.constant 2.000000e-01 : f32
    %175 = vector.broadcast %cst_87 : f32 to vector<16x16xf32>
    %176 = arith.mulf %175, %172 : vector<16x16xf32>
    %177 = arith.select %174, %172, %176 : vector<16x16xi1>, vector<16x16xf32>
    %178 = arith.addf %177, %0 : vector<16x16xf32>
    %cst_88 = arith.constant dense<0xFF800000> : vector<16xf32>
    %179 = vector.multi_reduction <maximumf>, %178, %cst_88 [1] : vector<16x16xf32> to vector<16xf32>
    %180 = vector.shape_cast %179 : vector<16xf32> to vector<16x1xf32>
    %181 = vector.broadcast %180 : vector<16x1xf32> to vector<16x16xf32>
    %182 = arith.subf %178, %181 : vector<16x16xf32>
    %183 = math.exp %182 : vector<16x16xf32>
    %184 = tpu.concatenate %167, %183 in 1 : vector<16x16xf32>, vector<16x16xf32> -> vector<16x32xf32>
    %185 = arith.truncf %184 : vector<16x32xf32> to vector<16x32xbf16>
    %186 = tpu.concatenate %145, %145 in 0 : vector<16x32xf32>, vector<16x32xf32> -> vector<32x32xf32>
    %187 = arith.mulf %186, %2 : vector<32x32xf32>
    %188 = arith.truncf %187 : vector<32x32xf32> to vector<32x32xbf16>
    %cst_89 = arith.constant dense<0.000000e+00> : vector<16x32xf32>
    %189 = tpu.matmul %185, %188, %cst_89 {dimension_numbers = #tpu.dot_dimension_numbers<[1], [0], [0], [1], [0, 0, 1, 1], [], []>} : vector<16x32xbf16>, vector<32x32xbf16>, vector<16x32xf32> -> vector<16x32xf32>
    %cst_90 = arith.constant dense<0.000000e+00> : vector<16x32xf32>
    %190 = tpu.matmul %185, %3, %cst_90 {dimension_numbers = #tpu.dot_dimension_numbers<[1], [0], [0], [1], [0, 0, 1, 1], [], []>} : vector<16x32xbf16>, vector<32x32xbf16>, vector<16x32xf32> -> vector<16x32xf32>
    %cst_91 = arith.constant 9.99999968E-21 : f32
    %191 = vector.broadcast %cst_91 : f32 to vector<16x32xf32>
    %192 = arith.maximumf %190, %191 : vector<16x32xf32>
    %193 = tpu.reciprocal %192 {approx = true} : vector<16x32xf32> -> vector<16x32xf32>
    %194 = vector.broadcast %1 : vector<16x1xf32> to vector<16x32xf32>
    %195 = arith.mulf %193, %194 : vector<16x32xf32>
    %c1_92 = arith.constant 1 : index
    %c0_93 = arith.constant 0 : index
    %c0_94 = arith.constant 0 : index
    %196 = vector.load %arg9[%c1_92, %c0_93, %c0_94] : memref<2x1x32xf32, #tpu.memory_space<vmem>>, vector<1x1x32xf32>
    %197 = vector.shape_cast %196 : vector<1x1x32xf32> to vector<1x32xf32>
    %198 = vector.broadcast %197 : vector<1x32xf32> to vector<16x32xf32>
    %199 = arith.addf %141, %198 : vector<16x32xf32>
    %200 = arith.mulf %189, %195 : vector<16x32xf32>
    %201 = arith.addf %199, %200 : vector<16x32xf32>
    %cst_95 = arith.constant dense<0.000000e+00> : vector<32xf32>
    %202 = vector.multi_reduction <add>, %201, %cst_95 [0] : vector<16x32xf32> to vector<32xf32>
    %203 = vector.shape_cast %202 : vector<32xf32> to vector<1x32xf32>
    %cst_96 = arith.constant 1.600000e+01 : f32
    %204 = vector.broadcast %cst_96 : f32 to vector<1x32xf32>
    %205 = arith.divf %203, %204 : vector<1x32xf32>
    %206 = vector.broadcast %205 : vector<1x32xf32> to vector<16x32xf32>
    %207 = arith.subf %201, %206 : vector<16x32xf32>
    %208 = arith.mulf %207, %207 : vector<16x32xf32>
    %cst_97 = arith.constant dense<0.000000e+00> : vector<32xf32>
    %209 = vector.multi_reduction <add>, %208, %cst_97 [0] : vector<16x32xf32> to vector<32xf32>
    %210 = vector.shape_cast %209 : vector<32xf32> to vector<1x32xf32>
    %cst_98 = arith.constant 1.600000e+01 : f32
    %211 = vector.broadcast %cst_98 : f32 to vector<1x32xf32>
    %212 = arith.divf %210, %211 : vector<1x32xf32>
    %213 = vector.broadcast %205 : vector<1x32xf32> to vector<16x32xf32>
    %214 = arith.subf %201, %213 : vector<16x32xf32>
    %cst_99 = arith.constant 9.99999974E-6 : f32
    %215 = vector.broadcast %cst_99 : f32 to vector<1x32xf32>
    %216 = arith.addf %212, %215 : vector<1x32xf32>
    %217 = math.rsqrt %216 : vector<1x32xf32>
    %218 = vector.broadcast %217 : vector<1x32xf32> to vector<16x32xf32>
    %219 = arith.mulf %214, %218 : vector<16x32xf32>
    %c1_100 = arith.constant 1 : index
    %c0_101 = arith.constant 0 : index
    %c0_102 = arith.constant 0 : index
    %220 = vector.load %arg10[%c1_100, %c0_101, %c0_102] : memref<2x1x32xf32, #tpu.memory_space<vmem>>, vector<1x1x32xf32>
    %221 = vector.shape_cast %220 : vector<1x1x32xf32> to vector<1x32xf32>
    %222 = vector.broadcast %221 : vector<1x32xf32> to vector<16x32xf32>
    %223 = arith.mulf %219, %222 : vector<16x32xf32>
    %c1_103 = arith.constant 1 : index
    %c0_104 = arith.constant 0 : index
    %c0_105 = arith.constant 0 : index
    %224 = vector.load %arg11[%c1_103, %c0_104, %c0_105] : memref<2x1x32xf32, #tpu.memory_space<vmem>>, vector<1x1x32xf32>
    %225 = vector.shape_cast %224 : vector<1x1x32xf32> to vector<1x32xf32>
    %226 = vector.broadcast %225 : vector<1x32xf32> to vector<16x32xf32>
    %227 = arith.addf %223, %226 : vector<16x32xf32>
    %228 = arith.truncf %227 : vector<16x32xf32> to vector<16x32xbf16>
    %c1_106 = arith.constant 1 : index
    %c0_107 = arith.constant 0 : index
    %c0_108 = arith.constant 0 : index
    %229 = vector.load %arg12[%c1_106, %c0_107, %c0_108] : memref<2x32x512xbf16, #tpu.memory_space<vmem>>, vector<1x32x512xbf16>
    %230 = vector.shape_cast %229 : vector<1x32x512xbf16> to vector<32x512xbf16>
    %cst_109 = arith.constant dense<0.000000e+00> : vector<16x512xf32>
    %231 = tpu.matmul %228, %230, %cst_109 {dimension_numbers = #tpu.dot_dimension_numbers<[1], [0], [0], [1], [0, 0, 1, 1], [], []>} : vector<16x32xbf16>, vector<32x512xbf16>, vector<16x512xf32> -> vector<16x512xf32>
    %c1_110 = arith.constant 1 : index
    %c0_111 = arith.constant 0 : index
    %c0_112 = arith.constant 0 : index
    %232 = vector.load %arg13[%c1_110, %c0_111, %c0_112] : memref<2x1x512xf32, #tpu.memory_space<vmem>>, vector<1x1x512xf32>
    %233 = vector.shape_cast %232 : vector<1x1x512xf32> to vector<1x512xf32>
    %234 = vector.broadcast %233 : vector<1x512xf32> to vector<16x512xf32>
    %235 = arith.addf %231, %234 : vector<16x512xf32>
    %cst_113 = arith.constant 0.000000e+00 : f32
    %236 = vector.broadcast %cst_113 : f32 to vector<16x512xf32>
    %237 = arith.maximumf %235, %236 : vector<16x512xf32>
    %238 = arith.truncf %237 : vector<16x512xf32> to vector<16x512xbf16>
    %c1_114 = arith.constant 1 : index
    %c0_115 = arith.constant 0 : index
    %c0_116 = arith.constant 0 : index
    %239 = vector.load %arg14[%c1_114, %c0_115, %c0_116] : memref<2x512x32xbf16, #tpu.memory_space<vmem>>, vector<1x512x32xbf16>
    %240 = vector.shape_cast %239 : vector<1x512x32xbf16> to vector<512x32xbf16>
    %cst_117 = arith.constant dense<0.000000e+00> : vector<16x32xf32>
    %241 = tpu.matmul %238, %240, %cst_117 {dimension_numbers = #tpu.dot_dimension_numbers<[1], [0], [0], [1], [0, 0, 1, 1], [], []>} : vector<16x512xbf16>, vector<512x32xbf16>, vector<16x32xf32> -> vector<16x32xf32>
    %c1_118 = arith.constant 1 : index
    %c0_119 = arith.constant 0 : index
    %c0_120 = arith.constant 0 : index
    %242 = vector.load %arg15[%c1_118, %c0_119, %c0_120] : memref<2x1x32xf32, #tpu.memory_space<vmem>>, vector<1x1x32xf32>
    %243 = vector.shape_cast %242 : vector<1x1x32xf32> to vector<1x32xf32>
    %244 = vector.broadcast %243 : vector<1x32xf32> to vector<16x32xf32>
    %245 = arith.addf %241, %244 : vector<16x32xf32>
    %246 = arith.addf %227, %245 : vector<16x32xf32>
    %cst_121 = arith.constant dense<0.000000e+00> : vector<32xf32>
    %247 = vector.multi_reduction <add>, %246, %cst_121 [0] : vector<16x32xf32> to vector<32xf32>
    %248 = vector.shape_cast %247 : vector<32xf32> to vector<1x32xf32>
    %cst_122 = arith.constant 1.600000e+01 : f32
    %249 = vector.broadcast %cst_122 : f32 to vector<1x32xf32>
    %250 = arith.divf %248, %249 : vector<1x32xf32>
    %251 = vector.broadcast %250 : vector<1x32xf32> to vector<16x32xf32>
    %252 = arith.subf %246, %251 : vector<16x32xf32>
    %253 = arith.mulf %252, %252 : vector<16x32xf32>
    %cst_123 = arith.constant dense<0.000000e+00> : vector<32xf32>
    %254 = vector.multi_reduction <add>, %253, %cst_123 [0] : vector<16x32xf32> to vector<32xf32>
    %255 = vector.shape_cast %254 : vector<32xf32> to vector<1x32xf32>
    %cst_124 = arith.constant 1.600000e+01 : f32
    %256 = vector.broadcast %cst_124 : f32 to vector<1x32xf32>
    %257 = arith.divf %255, %256 : vector<1x32xf32>
    %258 = vector.broadcast %250 : vector<1x32xf32> to vector<16x32xf32>
    %259 = arith.subf %246, %258 : vector<16x32xf32>
    %cst_125 = arith.constant 9.99999974E-6 : f32
    %260 = vector.broadcast %cst_125 : f32 to vector<1x32xf32>
    %261 = arith.addf %257, %260 : vector<1x32xf32>
    %262 = math.rsqrt %261 : vector<1x32xf32>
    %263 = vector.broadcast %262 : vector<1x32xf32> to vector<16x32xf32>
    %264 = arith.mulf %259, %263 : vector<16x32xf32>
    %c1_126 = arith.constant 1 : index
    %c0_127 = arith.constant 0 : index
    %c0_128 = arith.constant 0 : index
    %265 = vector.load %arg16[%c1_126, %c0_127, %c0_128] : memref<2x1x32xf32, #tpu.memory_space<vmem>>, vector<1x1x32xf32>
    %266 = vector.shape_cast %265 : vector<1x1x32xf32> to vector<1x32xf32>
    %267 = vector.broadcast %266 : vector<1x32xf32> to vector<16x32xf32>
    %268 = arith.mulf %264, %267 : vector<16x32xf32>
    %c1_129 = arith.constant 1 : index
    %c0_130 = arith.constant 0 : index
    %c0_131 = arith.constant 0 : index
    %269 = vector.load %arg17[%c1_129, %c0_130, %c0_131] : memref<2x1x32xf32, #tpu.memory_space<vmem>>, vector<1x1x32xf32>
    %270 = vector.shape_cast %269 : vector<1x1x32xf32> to vector<1x32xf32>
    %271 = vector.broadcast %270 : vector<1x32xf32> to vector<16x32xf32>
    %272 = arith.addf %268, %271 : vector<16x32xf32>
    %273 = arith.truncf %272 : vector<16x32xf32> to vector<16x32xbf16>
    %c0_132 = arith.constant 0 : index
    %c0_133 = arith.constant 0 : index
    %274 = vector.load %arg18[%c0_132, %c0_133] : memref<32x128xbf16, #tpu.memory_space<vmem>>, vector<32x128xbf16>
    %cst_134 = arith.constant dense<0.000000e+00> : vector<16x128xf32>
    %275 = tpu.matmul %273, %274, %cst_134 {dimension_numbers = #tpu.dot_dimension_numbers<[1], [0], [0], [1], [0, 0, 1, 1], [], []>} : vector<16x32xbf16>, vector<32x128xbf16>, vector<16x128xf32> -> vector<16x128xf32>
    %c0_135 = arith.constant 0 : index
    %c0_136 = arith.constant 0 : index
    %276 = vector.load %arg19[%c0_135, %c0_136] : memref<1x128xf32, #tpu.memory_space<vmem>>, vector<1x128xf32>
    %277 = vector.broadcast %276 : vector<1x128xf32> to vector<16x128xf32>
    %278 = arith.addf %275, %277 : vector<16x128xf32>
    %c0_137 = arith.constant 0 : index
    %c0_138 = arith.constant 0 : index
    %279 = vector.load %arg20[%c0_137, %c0_138] : memref<16x128xf32, #tpu.memory_space<vmem>>, vector<16x128xf32>
    tpu.vector_store %arg20[%c0_137, %c0_138], %278 {strides = array<i32>} : memref<16x128xf32, #tpu.memory_space<vmem>>, vector<16x128xf32>,
    return
  }
}

</mosaic_0001>

<bundles_post_ra>
// kernel: eq.8
= control target key start
LH: loop header
LB: loop body
LE: loop exit
PB: predicated region body
PF: predicated region fallthrough
CT: control target
= control target key end

     0   :  { %vm7_vm0 = vcmask 130048   ;;  %vm13_vm1 = vcmask 261248   ;;  %s39_s0 = inlined_call_operand.vmem [shape: s32[2,16], index: 0, kind: input, shape index: {}]   ;;  %s40_s1 = inlined_call_operand.vmem [shape: s32[32], index: 1, kind: output, shape index: {}]  }
   0x1   :  { %v4_v0 = vld [vmem:[%s39_s0] sm:$0x3]  ;;  %s22_s0 = smov 16  }
   0x2   :  { %5 = vst [vmem:[#allocation1] sm:$0x3] %v4_v0 }
   0x9   :  { %v10_v1 = vld [vmem:[#allocation1 + $0x1] sm:$0x1]   ;;  %v6_v2 = vld [vmem:[#allocation1] sm:$0x1]  }
   0xa   :  { %11 = vrot.lane.b32.xlu0 %v10_v1, %s22_s0  ;;  %8 = vst.msk [vmem:[#allocation0] sm:$0x1] %vm7_vm0, %v6_v2  }
  0x7c   :  { %v12_v3 = vpop.permute.xlu0 %11  }
  0x7d   :  { %14 = vst.msk [vmem:[#allocation0] sm:$0x1] %vm13_vm1, %v12_v3  }
  0x84   :  { %v17_v4 = vld [vmem:[#allocation0] sm:$0x1] }
  0x85   :  { %20 = vst [vmem:[%s40_s1] sm:$0x1] %v17_v4 }

// kernel: model_forward.1
= control target key start
LH: loop header
LB: loop body
LE: loop exit
PB: predicated region body
PF: predicated region fallthrough
CT: control target
= control target key end

     0   :  { %vm88_vm0 = vcmask 1043456   ;;  %vm84_vm1 = vcmask 64512   ;;  %vm123_vm2 = vcmask 261120   ;;  %v2322_v17 = vmov 1   ;;  %s3024_s4 = inlined_call_operand.vmem [shape: bf16[8,32], index: 4, kind: input, shape index: {}]   ;;  %s3025_s0 = inlined_call_operand.vmem [shape: f32[16,8], index: 0, kind: input, shape index: {}]   ;;  %s3026_s5 = inlined_call_operand.vmem [shape: f32[1,32], index: 5, kind: input, shape index: {}]   ;;  %s3027_s9 = inlined_call_operand.vmem [shape: f32[2,1,32], index: 9, kind: input, shape index: {}]   ;;  %s3028_s6 = inlined_call_operand.vmem [shape: bf16[2,32,32], index: 6, kind: input, shape index: {}]   ;;  %s3029_s8 = inlined_call_operand.vmem [shape: f32[2,32,2], index: 8, kind: input, shape index: {}]   ;;  %s3030_s3 = inlined_call_operand.vmem [shape: f32[32,32], index: 3, kind: input, shape index: {}]   ;;  %s3031_s7 = inlined_call_operand.vmem [shape: f32[2,2,32], index: 7, kind: input, shape index: {}]   ;;  %s3032_s1 = inlined_call_operand.vmem [shape: f32[16,16], index: 1, kind: input, shape index: {}]   ;;  %s3033_s2 = inlined_call_operand.vmem [shape: f32[16,1], index: 2, kind: input, shape index: {}]   ;;  %s3034_s10 = inlined_call_operand.vmem [shape: f32[2,1,32], index: 10, kind: input, shape index: {}]   ;;  %s3035_s11 = inlined_call_operand.vmem [shape: f32[2,1,32], index: 11, kind: input, shape index: {}]   ;;  %s3036_s12 = inlined_call_operand.vmem [shape: bf16[2,32,512], index: 12, kind: input, shape index: {}]   ;;  %s3037_s14 = inlined_call_operand.vmem [shape: bf16[2,512,32], index: 14, kind: input, shape index: {}]   ;;  %s3038_s15 = inlined_call_operand.vmem [shape: f32[2,1,32], index: 15, kind: input, shape index: {}]   ;;  %s3039_s13 = inlined_call_operand.vmem [shape: f32[2,1,512], index: 13, kind: input, shape index: {}]   ;;  %s3040_s16 = inlined_call_operand.vmem [shape: f32[2,1,32], index: 16, kind: input, shape index: {}]   ;;  %s3041_s17 = inlined_call_operand.vmem [shape: f32[2,1,32], index: 17, kind: input, shape index: {}]   ;;  %s3042_s19 = inlined_call_operand.vmem [shape: f32[1,128], index: 19, kind: input, shape index: {}]   ;;  %s3043_s18 = inlined_call_operand.vmem [shape: bf16[32,128], index: 18, kind: input, shape index: {}]   ;;  %s3044_s20 = inlined_call_operand.vmem [shape: f32[16,128], index: 20, kind: output, shape index: {}]  }
   0x1   :  { %3048 = sst [smem:[#allocation2_spill]] %s3024_s4  ;;  %v174_v7 = vld [vmem:[%s3029_s8 + $0x18] sm:$0xff]  ;;  %v173_v8 = vld [vmem:[%s3029_s8 + $0x10] sm:$0xff]  ;;  %v172_v9 = vld [vmem:[%s3029_s8 + $0x8] sm:$0xff]  ;;  %2259 = vset.pattern.permute.xlu0 %v2322_v17  ;;  %v2323_v18 = vmov 0   ;;  %vm219_vm5 = vcmask 130048  }
   0x2   :  { %3049 = sst [smem:[#allocation3_spill]] %s3025_s0  ;;  %187 = vmatpush.msra.mxu3 %v174_v7  ;;  %v171_v16 = vld [vmem:[%s3029_s8] sm:$0xff]  ;;  %2260 = vset.pattern.permute.xlu1 %v2323_v18  ;;  %v2475_v20 = vld [vmem:[%s3030_s3 + $0x10] sm:$0xff]  ;;  %v2480_v21 = vld [vmem:[%s3030_s3 + $0x18] sm:$0xff] }
   0x3   :  { %3050 = sst [smem:[#allocation4_spill]] %s3026_s5  ;;  %2266 = vset.pattern.permute.xlu2 %v2323_v18  ;;  %v2489_v25 = vld [vmem:[%s3030_s3 + $0x8] sm:$0xff]  ;;  %v2494_v27 = vld [vmem:[%s3030_s3] sm:$0xff]  ;;  %v2523_v63 = vpack.c.bf16 %v2480_v21, %v2475_v20 }
   0x4   :  { %3051 = sst [smem:[#allocation5_spill]] %s3027_s9  ;;  %188 = vmatpush.msra.mxu3 %v173_v8  ;;  %v141_v29 = vld [vmem:[%s3031_s7] sm:$0x3]  ;;  %v2515_v54 = vld [vmem:[%s3032_s1 + $0x8] sm:$0xff] }
   0x5   :  { %3052 = sst [smem:[#allocation6_spill]] %s3028_s6  ;;  %v2506_v41 = vld [vmem:[%s3032_s1] sm:$0xff]  ;;  %s2324_s1 = smov 16  }
   0x6   :  { %s3053_s23 = sld [smem:[#allocation2_spill]]  ;;  %189 = vmatpush.msra.mxu3 %v172_v9 }
   0x7   :  { %s3054_s25 = sld [smem:[#allocation3_spill]] }
   0x8   :  { %s3055_s6 = sld [smem:[#allocation6_spill]]  ;;  %190 = vmatpush.msra.mxu3 %v171_v16 }
   0x9   :  { %s3056_s9 = sld [smem:[#allocation4_spill]] }
   0xa   :  { %s3057_s21 = sld [smem:[#allocation5_spill]] }
   0xc   :  { %v79_v0 = vld [vmem:[%s3053_s23] sm:$0xf] }
   0xd   :  { %v76_v1 = vld [vmem:[%s3054_s25] sm:$0xff]  ;;  %v77_v2 = vld [vmem:[%s3054_s25 + $0x8] sm:$0xff]  ;;  %v90_v3 = vsel %vm88_vm0, %v79_v0, 0  ;;  %v2528_v0 = vpack.c.bf16 %v2489_v25, %v2494_v27 }
   0xe   :  { %v78_v4 = vpack.c.bf16 %v77_v2, %v76_v1  ;;  %99 = vmatpush.bf16.msra.mxu0 %v90_v3  ;;  %v2170_v5 = vld [vmem:[%s3055_s6 + $0x8] sm:$0xff]  ;;  %v2169_v6 = vld [vmem:[%s3055_s6] sm:$0xff] }
   0xf   :  { %133 = vmatpush.bf16.msra.mxu1 %v2170_v5  ;;  %v2274_v11 = vld [vmem:[%s3056_s9] ss:$0 sm:$0xff] }
  0x11   :  { %1711 = vmatmul.msk.bf16.vlgmr.msra.gmra.mxu0 %vm84_vm1, %v78_v4 }
  0x12   :  { %303 = vmatpush.bf16.msrb.mxu0 %v2523_v63 }
  0x13   :  { %134 = vmatpush.bf16.msra.mxu1 %v2169_v6 }
  0x16   :  { %304 = vmatpush.bf16.msrb.mxu0 %v2528_v0 }
  0x8e   :  { %v101_v10 = vpop.f32.mrf.mxu0 }
  0x8f   :  { %v2458_v13 = vadd.f32 %v2274_v11, %v101_v10  ;;  %v68_v10 = vld [vmem:[%s3033_s2] sm:$0xff] }
  0x96   :  { %v103_v12 = vpop.f32.mrf.mxu0 }
  0x97   :  { %v2460_v14 = vadd.f32 %v2274_v11, %v103_v12  ;;  %v69_v11 = vld [vmem:[%s3033_s2 + $0x8] sm:$0xff] }
  0x99   :  { %v106_v15 = vpack.c.bf16 %v2460_v14, %v2458_v13 }
  0x9b   :  { %1720 = vmatmul.msk.bf16.vlgmr.msra.gmra.mxu1 %vm123_vm2, %v106_v15 }
 0x118   :  { %v136_v19 = vpop.f32.mrf.mxu1 }
 0x119   :  { %1724 = vmatmul.msk.f32.vlgmr.msra.gmra.mxu3 %vm123_vm2, %v136_v19  ;;  %v276_v23 = vmul.f32 %v136_v19, %v2475_v20  ;;  %v274_v30 = vmul.f32 %v136_v19, %v2494_v27 }
 0x120   :  { %v138_v22 = vpop.f32.mrf.mxu1 }
 0x121   :  { %1721 = vmatpush.xpose.msk.msra.mxu2 %vm123_vm2, %v138_v22  ;;  %1725 = vmatmul.msk.f32.gmra.mxu3 %vm123_vm2, %v138_v22  ;;  %v277_v24 = vmul.f32 %v138_v22, %v2480_v21  ;;  %v275_v28 = vmul.f32 %v138_v22, %v2489_v25 }
 0x123   :  { %v279_v26 = vpack.c.bf16 %v277_v24, %v276_v23  ;;  %v278_v31 = vpack.c.bf16 %v275_v28, %v274_v30 }
 0x125   :  { %1722 = vmatpush.xpose.msk.msra.mxu2 %vm123_vm2, %v136_v19 }
 0x128   :  { %1723 = vmatmul.msk.f32.vlgmr.msra.gmra.mxu2 %vm123_vm2, %v141_v29 }
 0x129   :  { %289 = vmatpush.bf16.msrb.mxu2 %v279_v26 }
 0x12d   :  { %290 = vmatpush.bf16.msrb.mxu2 %v278_v31 }
 0x19c   :  { %v192_v32 = vpop.f32.mrf.mxu3 }
 0x19d   :  { %200 = vperm.xlu1 %2260, %v192_v32   ;;  %233 = vperm.xlu0 %2259, %v192_v32  }
 0x1a4   :  { %v195_v33 = vpop.f32.mrf.mxu3 }
 0x1a5   :  { %205 = vperm.xlu1 %2260, %v195_v33   ;;  %237 = vperm.xlu0 %2259, %v195_v33  }
 0x1ab   :  { %v168_v34 = vpop.f32.mrf.mxu2 }
 0x1ac   :  { %v208_v35 = vperm.slane %v168_v34, 0  ;;  %v240_v36 = vperm.slane %v168_v34, 1 }
 0x20f   :  { %v201_v37 = vpop.permute.xlu1 %200  ;;  %v234_v38 = vpop.permute.xlu0 %233 }
 0x210   :  { %v209_v39 = vadd.f32 %v208_v35, %v201_v37  ;;  %v241_v40 = vadd.f32 %v240_v36, %v234_v38 }
 0x212   :  { %vm211_vm3 = vcmp.gt.f32.partialorder %v209_v39, 0.0  ;;  %v213_v42 = vmul.f32 0.2, %v209_v39  ;;  %v245_v43 = vmul.f32 0.2, %v241_v40  ;;  %vm243_vm4 = vcmp.gt.f32.partialorder %v241_v40, 0.0 }
 0x214   :  { %v247_v44 = vsel %vm243_vm4, %v241_v40, %v245_v43  ;;  %v215_v45 = vsel %vm211_vm3, %v209_v39, %v213_v42  ;;  %v2325_v40 = vmov 16.0   ;;  %v2275_v43 = vld [vmem:[%s3057_s21] ss:$0 sm:$0xff] }
 0x215   :  { %v249_v46 = vadd.f32 %v247_v44, %v2506_v41  ;;  %v217_v47 = vadd.f32 %v215_v45, %v2506_v41 }
 0x217   :  { %v206_v48 = vpop.permute.xlu1 %205  ;;  %v238_v49 = vpop.permute.xlu0 %237  ;;  %v251_v50 = vsel %vm219_vm5, %v249_v46, -inf  ;;  %v220_v51 = vsel %vm219_vm5, %v217_v47, -inf }
 0x218   :  { %v210_v52 = vadd.f32 %v208_v35, %v206_v48  ;;  %v242_v53 = vadd.f32 %v240_v36, %v238_v49  ;;  %252 = vmax.xlane.f32.xlu2 %v251_v50  ;;  %221 = vmax.xlane.f32.xlu0 %v220_v51  ;;  %v331_v48 = vadd.f32 %v2275_v43, %v2458_v13 }
 0x219   :  { %v332_v51 = vadd.f32 %v2275_v43, %v2460_v14  ;;  %v1730_v43 = vld [vmem:[%s3036_s12] sm:$0xf] }
 0x21a   :  { %vm212_vm6 = vcmp.gt.f32.partialorder %v210_v52, 0.0  ;;  %v214_v55 = vmul.f32 0.2, %v210_v52  ;;  %vm244_vm7 = vcmp.gt.f32.partialorder %v242_v53, 0.0  ;;  %v246_v56 = vmul.f32 0.2, %v242_v53 }
 0x21c   :  { %v248_v57 = vsel %vm244_vm7, %v242_v53, %v246_v56  ;;  %v216_v58 = vsel %vm212_vm6, %v210_v52, %v214_v55 }
 0x21d   :  { %v250_v59 = vadd.f32 %v248_v57, %v2515_v54  ;;  %v218_v60 = vadd.f32 %v216_v58, %v2515_v54 }
 0x21f   :  { %v254_v61 = vsel %vm219_vm5, %v250_v59, -inf  ;;  %v223_v62 = vsel %vm219_vm5, %v218_v60, -inf }
 0x220   :  { %255 = vmax.xlane.f32.xlu2 %v254_v61  ;;  %224 = vmax.xlane.f32.xlu1 %v223_v62 }
 0x28b   :  { %v253_v1 = vpop.xlane.xlu2 %252  ;;  %v222_v12 = vpop.xlane.xlu0 %221 }
 0x28c   :  { %v257_v2 = vsub.f32 %v249_v46, %v253_v1  ;;  %v226_v16 = vsub.f32 %v217_v47, %v222_v12 }
 0x28e   :  { %v259_v3 = vmul.f32 1.442695, %v257_v2  ;;  %v228_v22 = vmul.f32 1.442695, %v226_v16 }
 0x290   :  { %2288 = vpow2.f32 %v259_v3 }
 0x293   :  { %v256_v4 = vpop.xlane.xlu2 %255  ;;  %v225_v15 = vpop.xlane.xlu1 %224 }
 0x294   :  { %v258_v5 = vsub.f32 %v250_v59, %v256_v4  ;;  %v227_v19 = vsub.f32 %v218_v60, %v225_v15 }
 0x296   :  { %v261_v6 = vmul.f32 1.442695, %v258_v5  ;;  %v2289_v7 = vpop.eup %2288  ;;  %v230_v23 = vmul.f32 1.442695, %v227_v19  ;;  %v2175_v19 = vld [vmem:[%s3036_s12 + $0x24] sm:$0xf] }
 0x298   :  { %2290 = vpow2.f32 %v261_v6 }
 0x299   :  { %2292 = vpow2.f32 %v228_v22  ;;  %v1748_v22 = vld [vmem:[%s3036_s12 + $0x30] sm:$0xf0] }
 0x29a   :  { %2294 = vpow2.f32 %v230_v23  ;;  %v1754_v23 = vld [vmem:[%s3036_s12 + $0x28] sm:$0xf] }
 0x29e   :  { %v2291_v8 = vpop.eup %2290 }
 0x29f   :  { %v2261_v9 = vpack.i.bf16 %v2291_v8, %v2289_v7  ;;  %v2293_v26 = vpop.eup %2292 }
 0x2a0   :  { %v2295_v30 = vpop.eup %2294 }
 0x2a1   :  { %2262 = vrot.lane.b32.xlu2 %v2261_v9, %s2324_s1 }
 0x2a9   :  { %317 = vperm.xlu2 %2266, %v68_v10  }
 0x2b1   :  { %322 = vperm.xlu2 %2266, %v69_v11  }
 0x2b9   :  { %2267 = vset.pattern.permute.xlu2 %v2322_v17 }
 0x2fb   :  { %v2263_v24 = vpop.permute.xlu2 %2262 }
 0x2fc   :  { %v2265_v28 = vunpack.i.h.bf16 %v2263_v24  ;;  %v2264_v29 = vunpack.i.l.bf16 %v2263_v24 }
 0x2fe   :  { %v271_v31 = vsel %vm219_vm5, %v2293_v26, %v2264_v29  ;;  %v272_v32 = vsel %vm219_vm5, %v2295_v30, %v2265_v28  ;;  %v1751_v26 = vor.u32 %v2175_v19, %v1748_v22  ;;  %v2178_v28 = vld [vmem:[%s3036_s12 + $0x34] sm:$0xf0]  ;;  %v1746_v29 = vld [vmem:[%s3036_s12 + $0x20] sm:$0xf] }
 0x2ff   :  { %v273_v33 = vpack.c.bf16 %v272_v32, %v271_v31  ;;  %v1755_v30 = vor.u32 %v2178_v28, %v1754_v23  ;;  %v2177_v31 = vld [vmem:[%s3036_s12 + $0x2c] sm:$0xf0]  ;;  %v2176_v32 = vld [vmem:[%s3036_s12 + $0x2c] sm:$0xf]  ;;  %v2276_v22 = vld [vmem:[%s3034_s10] ss:$0 sm:$0xff] }
 0x300   :  { %475 = vmatpush.bf16.msrb.mxu3 %v1751_v26  ;;  %v2277_v28 = vld [vmem:[%s3035_s11] ss:$0 sm:$0xff] }
 0x301   :  { %1726 = vmatmul.msk.bf16.vlgmr.msrb.gmra.mxu2 %vm123_vm2, %v273_v33  ;;  %1727 = vmatmul.msk.bf16.vlgmr.msrb.gmra.mxu0 %vm123_vm2, %v273_v33  ;;  %v1756_v33 = vld [vmem:[%s3036_s12 + $0x38] sm:$0xf0] }
 0x302   :  { %489 = vmatpush.bf16.msra.mxu2 %v1755_v30 }
 0x303   :  { %v2543_v17 = vpop.permute.xlu2 %317 }
 0x30b   :  { %v2549_v47 = vpop.permute.xlu2 %322 }
 0x37e   :  { %v306_v34 = vpop.f32.mrf.mxu0 }
 0x37f   :  { %v311_v35 = vmax.f32 %v306_v34, 1e-20 }
 0x381   :  { %2296 = vrcp.f32 %v311_v35  ;;  %v2171_v35 = vld [vmem:[%s3036_s12 + $0x4] sm:$0xf] }
 0x382   :  { %2298 = vrcp.f32 %v2325_v40  ;;  %v1738_v40 = vld [vmem:[%s3036_s12 + $0x8] sm:$0xf] }
 0x384   :  { %v292_v38 = vpop.f32.mrf.mxu2 }
 0x386   :  { %v308_v36 = vpop.f32.mrf.mxu0 }
 0x387   :  { %v2297_v37 = vpop.eup %2296  ;;  %v312_v39 = vmax.f32 %v308_v36, 1e-20  ;;  %v1732_v36 = vld [vmem:[%s3036_s12 + $0x10] sm:$0xf0] }
 0x388   :  { %v325_v42 = vmul.f32 %v2297_v37, %v2543_v17  ;;  %v2299_v44 = vpop.eup %2298  ;;  %v1747_v37 = vor.u32 %v2177_v31, %v1746_v29 }
 0x389   :  { %2300 = vrcp.f32 %v312_v39  ;;  %v347_v55 = vmul.f32 16.0, %v2299_v44  ;;  %vm351_vm8 = vweird.f32 %v2299_v44  ;;  %v1735_v39 = vor.u32 %v2171_v35, %v1732_v36  ;;  %v2199_v35 = vld [vmem:[%s3037_s14 + $0xa0] sm:$0xff]  ;;  %v2181_v36 = vld [vmem:[%s3037_s14 + $0x10] sm:$0xff] }
 0x38a   :  { %v333_v45 = vmul.f32 %v325_v42, %v292_v38  ;;  %v1759_v38 = vor.u32 %v2176_v32, %v1756_v33  ;;  %v2174_v42 = vld [vmem:[%s3036_s12 + $0x14] sm:$0xf0]  ;;  %461 = vmatpush.bf16.msrb.mxu1 %v1747_v37  ;;  %v2205_v37 = vld [vmem:[%s3037_s14 + $0xd0] sm:$0xff] }
 0x38b   :  { %v348_v59 = vsub.f32 1.0, %v347_v55  ;;  %476 = vmatpush.bf16.msrb.mxu3 %v1735_v39  ;;  %v2186_v55 = vld [vmem:[%s3037_s14 + $0x38] sm:$0xff] }
 0x38c   :  { %v294_v50 = vpop.f32.mrf.mxu2  ;;  %v335_v52 = vadd.f32 %v333_v45, %v331_v48  ;;  %503 = vmatpush.bf16.msra.mxu0 %v1759_v38  ;;  %v1739_v45 = vor.u32 %v2174_v42, %v1738_v40  ;;  %v2172_v48 = vld [vmem:[%s3036_s12 + $0xc] sm:$0xf]  ;;  %v2190_v38 = vld [vmem:[%s3037_s14 + $0x58] sm:$0xff] }
 0x38d   :  { %v349_v62 = vmul.f32 %v2299_v44, %v348_v59  ;;  %v2202_v59 = vld [vmem:[%s3037_s14 + $0xb8] sm:$0xff]  ;;  %v2180_v40 = vld [vmem:[%s3037_s14 + $0x8] sm:$0xff] }
 0x38e   :  { %v337_v57 = vsel %vm123_vm2, %v335_v52, 0.0  ;;  %490 = vmatpush.bf16.msra.mxu2 %v1739_v45  ;;  %v2198_v39 = vld [vmem:[%s3037_s14 + $0x98] sm:$0xff]  ;;  %v2204_v42 = vld [vmem:[%s3037_s14 + $0xc8] sm:$0xff]  ;;  %v2179_v45 = vld [vmem:[%s3037_s14] sm:$0xff] }
 0x38f   :  { %v2301_v46 = vpop.eup %2300  ;;  %v350_v13 = vadd.f32 %v2299_v44, %v349_v62 }
 0x390   :  { %v326_v49 = vmul.f32 %v2301_v46, %v2549_v47  ;;  %v2173_v46 = vld [vmem:[%s3036_s12 + $0xc] sm:$0xf0] }
 0x391   :  { %v2556_v5 = vsel %vm351_vm8, %v2299_v44, %v350_v13  ;;  %v2184_v13 = vld [vmem:[%s3037_s14 + $0x28] sm:$0xff] }
 0x392   :  { %v334_v53 = vmul.f32 %v326_v49, %v294_v50  ;;  %v1740_v49 = vld [vmem:[%s3036_s12 + $0x18] sm:$0xf0]  ;;  %v1731_v50 = vor.u32 %v2173_v46, %v1730_v43  ;;  %811 = vmatpush.bf16.msrb.mxu2 %v2202_v59  ;;  %v2189_v43 = vld [vmem:[%s3037_s14 + $0x50] sm:$0xff]  ;;  %v2203_v46 = vld [vmem:[%s3037_s14 + $0xc0] sm:$0xff] }
 0x394   :  { %v336_v56 = vadd.f32 %v334_v53, %v332_v51  ;;  %v1743_v51 = vor.u32 %v2172_v48, %v1740_v49  ;;  %462 = vmatpush.bf16.msrb.mxu1 %v1731_v50  ;;  %v2188_v48 = vld [vmem:[%s3037_s14 + $0x48] sm:$0xff]  ;;  %v2187_v50 = vld [vmem:[%s3037_s14 + $0x40] sm:$0xff] }
 0x395   :  { %v2196_v49 = vld [vmem:[%s3037_s14 + $0x88] sm:$0xff] }
 0x396   :  { %v338_v58 = vsel %vm123_vm2, %v336_v56, 0.0  ;;  %504 = vmatpush.bf16.msra.mxu0 %v1743_v51  ;;  %v2195_v51 = vld [vmem:[%s3037_s14 + $0x80] sm:$0xff] }
 0x397   :  { %v339_v60 = vadd.f32 %v338_v58, %v337_v57  ;;  %v2194_v58 = vld [vmem:[%s3037_s14 + $0x78] sm:$0xff] }
 0x398   :  { %783 = vmatpush.bf16.msra.mxu1 %v2186_v55  ;;  %797 = vmatpush.bf16.msra.mxu3 %v2194_v58 }
 0x399   :  { %v340_v61 = vrot.slane %v339_v60, 4 }
 0x39b   :  { %v341_v1 = vadd.f32 %v340_v61, %v339_v60  ;;  %v2185_v60 = vld [vmem:[%s3037_s14 + $0x30] sm:$0xff] }
 0x39c   :  { %v2209_v61 = vld [vmem:[%s3037_s14 + $0xf0] sm:$0xff]  ;;  %784 = vmatpush.bf16.msra.mxu1 %v2185_v60 }
 0x39d   :  { %v342_v2 = vrot.slane %v341_v1, 2 }
 0x39f   :  { %v343_v3 = vadd.f32 %v342_v2, %v341_v1  ;;  %v2193_v1 = vld [vmem:[%s3037_s14 + $0x70] sm:$0xff] }
 0x3a0   :  { %v2201_v2 = vld [vmem:[%s3037_s14 + $0xb0] sm:$0xff]  ;;  %798 = vmatpush.bf16.msra.mxu3 %v2193_v1  ;;  %785 = vmatpush.bf16.msra.mxu1 %v2184_v13 }
 0x3a1   :  { %v344_v4 = vrot.slane %v343_v3, 1  ;;  %812 = vmatpush.bf16.msrb.mxu2 %v2201_v2 }
 0x3a3   :  { %v345_v14 = vadd.f32 %v344_v4, %v343_v3  ;;  %v2208_v3 = vld [vmem:[%s3037_s14 + $0xe8] sm:$0xff] }
 0x3a4   :  { %v2192_v4 = vld [vmem:[%s3037_s14 + $0x68] sm:$0xff] }
 0x3a5   :  { %v353_v6 = vmul.f32 %v2556_v5, %v345_v14  ;;  %v2200_v14 = vld [vmem:[%s3037_s14 + $0xa8] sm:$0xff]  ;;  %799 = vmatpush.bf16.msra.mxu3 %v2192_v4 }
 0x3a6   :  { %813 = vmatpush.bf16.msrb.mxu2 %v2200_v14 }
 0x3a7   :  { %v2559_v7 = vsub.f32 %v335_v52, %v353_v6  ;;  %v2561_v8 = vsub.f32 %v336_v56, %v353_v6  ;;  %v2210_v56 = vld [vmem:[%s3037_s14 + $0xf8] sm:$0xff]  ;;  %v2183_v6 = vld [vmem:[%s3037_s14 + $0x20] sm:$0xff] }
 0x3a8   :  { %825 = vmatpush.bf16.msrb.mxu0 %v2210_v56  ;;  %786 = vmatpush.bf16.msra.mxu1 %v2183_v6 }
 0x3a9   :  { %v356_v9 = vmul.f32 %v2559_v7, %v2559_v7  ;;  %v357_v10 = vmul.f32 %v2561_v8, %v2561_v8 }
 0x3aa   :  { %814 = vmatpush.bf16.msrb.mxu2 %v2199_v35 }
 0x3ab   :  { %v358_v11 = vsel %vm123_vm2, %v356_v9, 0.0  ;;  %v359_v12 = vsel %vm123_vm2, %v357_v10, 0.0  ;;  %v2207_v9 = vld [vmem:[%s3037_s14 + $0xe0] sm:$0xff] }
 0x3ac   :  { %v360_v15 = vadd.f32 %v359_v12, %v358_v11  ;;  %826 = vmatpush.bf16.msrb.mxu0 %v2209_v61 }
 0x3ae   :  { %v361_v16 = vrot.slane %v360_v15, 4  ;;  %815 = vmatpush.bf16.msrb.mxu2 %v2198_v39 }
 0x3b0   :  { %v362_v24 = vadd.f32 %v361_v16, %v360_v15  ;;  %827 = vmatpush.bf16.msrb.mxu0 %v2208_v3 }
 0x3b2   :  { %v363_v34 = vrot.slane %v362_v24, 2 }
 0x3b4   :  { %v364_v44 = vadd.f32 %v363_v34, %v362_v24  ;;  %828 = vmatpush.bf16.msrb.mxu0 %v2207_v9  ;;  %v2191_v34 = vld [vmem:[%s3037_s14 + $0x60] sm:$0xff] }
 0x3b5   :  { %800 = vmatpush.bf16.msra.mxu3 %v2191_v34 }
 0x3b6   :  { %v365_v52 = vrot.slane %v364_v44, 1 }
 0x3b8   :  { %v366_v53 = vadd.f32 %v365_v52, %v364_v44  ;;  %v2197_v44 = vld [vmem:[%s3037_s14 + $0x90] sm:$0xff]  ;;  %v402_v52 = vld [vmem:[%s3039_s13] sm:$0xf] }
 0x3b9   :  { %801 = vmatpush.bf16.msra.mxu3 %v2190_v38  ;;  %816 = vmatpush.bf16.msrb.mxu2 %v2197_v44  ;;  %v404_v55 = vperm.slane %v402_v52, 0  ;;  %v407_v56 = vperm.slane %v402_v52, 3  ;;  %v406_v13 = vperm.slane %v402_v52, 2 }
 0x3ba   :  { %v367_v57 = vmul.f32 %v366_v53, %v2556_v5 }
 0x3bc   :  { %v368_v62 = vadd.f32 1e-05, %v367_v57 }
 0x3bd   :  { %802 = vmatpush.bf16.msra.mxu3 %v2189_v43  ;;  %817 = vmatpush.bf16.msrb.mxu2 %v2196_v49 }
 0x3be   :  { %2302 = vrsqrt.f32 %v368_v62  ;;  %vm375_vm10 = vweird.f32 %v368_v62 }
 0x3c1   :  { %803 = vmatpush.bf16.msra.mxu3 %v2188_v48  ;;  %818 = vmatpush.bf16.msrb.mxu2 %v2195_v51 }
 0x3c4   :  { %v2303_v10 = vpop.eup %2302 }
 0x3c5   :  { %v370_v11 = vmul.f32 %v2303_v10, %v368_v62  ;;  %vm376_vm9 = vweird.f32 %v2303_v10  ;;  %804 = vmatpush.bf16.msra.mxu3 %v2187_v50  ;;  %v405_v62 = vperm.slane %v402_v52, 1 }
 0x3c6   :  { %vm377_vm11 = vmor %vm375_vm10, %vm376_vm9 }
 0x3c7   :  { %v371_v12 = vmul.f32 %v2303_v10, %v370_v11 }
 0x3c9   :  { %v372_v15 = vmul.f32 0.5, %v371_v12 }
 0x3cb   :  { %v373_v16 = vsub.f32 1.5, %v372_v15 }
 0x3cd   :  { %v374_v19 = vmul.f32 %v2303_v10, %v373_v16 }
 0x3cf   :  { %v378_v23 = vsel %vm377_vm11, %v2303_v10, %v374_v19 }
 0x3d0   :  { %v379_v24 = vmul.f32 %v378_v23, %v2559_v7  ;;  %v380_v26 = vmul.f32 %v378_v23, %v2561_v8  ;;  %v2182_v7 = vld [vmem:[%s3037_s14 + $0x18] sm:$0xff] }
 0x3d1   :  { %v2206_v8 = vld [vmem:[%s3037_s14 + $0xd8] sm:$0xff]  ;;  %787 = vmatpush.bf16.msra.mxu1 %v2182_v7  ;;  %v2278_v7 = vld [vmem:[%s3038_s15] ss:$0 sm:$0xff] }
 0x3d2   :  { %v385_v29 = vmul.f32 %v2276_v22, %v379_v24  ;;  %v386_v30 = vmul.f32 %v2276_v22, %v380_v26  ;;  %829 = vmatpush.bf16.msrb.mxu0 %v2206_v8 }
 0x3d4   :  { %v2668_v31 = vadd.f32 %v2277_v28, %v385_v29  ;;  %v2670_v32 = vadd.f32 %v2277_v28, %v386_v30 }
 0x3d5   :  { %788 = vmatpush.bf16.msra.mxu1 %v2181_v36 }
 0x3d6   :  { %v393_v33 = vpack.c.bf16 %v2670_v32, %v2668_v31  ;;  %830 = vmatpush.bf16.msrb.mxu0 %v2205_v37 }
 0x3d8   :  { %1760 = vmatmul.msk.bf16.vlgmr.msrb.gmra.mxu1 %vm123_vm2, %v393_v33  ;;  %1761 = vmatmul.msk.bf16.vlgmr.msrb.gmra.mxu3 %vm123_vm2, %v393_v33 }
 0x3d9   :  { %1762 = vmatmul.msk.bf16.vlgmr.msra.gmra.mxu2 %vm123_vm2, %v393_v33  ;;  %1763 = vmatmul.msk.bf16.vlgmr.msra.gmra.mxu0 %vm123_vm2, %v393_v33 }
 0x3da   :  { %789 = vmatpush.bf16.msra.mxu1 %v2180_v40  ;;  %831 = vmatpush.bf16.msrb.mxu0 %v2204_v42 }
 0x3de   :  { %790 = vmatpush.bf16.msra.mxu1 %v2179_v45  ;;  %832 = vmatpush.bf16.msrb.mxu0 %v2203_v46 }
 0x3e2   :  { %1088 = vmatpush.bf16.msra.mxu0 %v2523_v63 }
 0x3e6   :  { %1089 = vmatpush.bf16.msra.mxu0 %v2528_v0 }
 0x455   :  { %v464_v53 = vpop.f32.mrf.mxu1 }
 0x456   :  { %v506_v63 = vpop.f32.mrf.mxu0  ;;  %v465_v58 = vadd.f32 %v464_v53, %v404_v55 }
 0x457   :  { %v507_v60 = vadd.f32 %v506_v63, %v407_v56 }
 0x458   :  { %v511_v3 = vmax.f32 %v465_v58, 0.0 }
 0x459   :  { %v514_v14 = vmax.f32 %v507_v60, 0.0 }
 0x45b   :  { %v478_v57 = vpop.f32.mrf.mxu3 }
 0x45c   :  { %v492_v59 = vpop.f32.mrf.mxu2  ;;  %v479_v9 = vadd.f32 %v478_v57, %v405_v62 }
 0x45d   :  { %v466_v61 = vpop.f32.mrf.mxu1  ;;  %v493_v11 = vadd.f32 %v492_v59, %v406_v13 }
 0x45e   :  { %v467_v1 = vadd.f32 %v466_v61, %v404_v55  ;;  %v508_v2 = vpop.f32.mrf.mxu0  ;;  %v512_v23 = vmax.f32 %v479_v9, 0.0 }
 0x45f   :  { %v509_v0 = vadd.f32 %v508_v2, %v407_v56  ;;  %v513_v26 = vmax.f32 %v493_v11, 0.0 }
 0x460   :  { %v515_v4 = vmax.f32 %v467_v1, 0.0 }
 0x461   :  { %v518_v6 = vmax.f32 %v509_v0, 0.0 }
 0x462   :  { %v519_v10 = vpack.c.bf16 %v515_v4, %v511_v3 }
 0x463   :  { %v522_v12 = vpack.c.bf16 %v518_v6, %v514_v14  ;;  %v480_v15 = vpop.f32.mrf.mxu3  ;;  %v2212_v14 = vld [vmem:[%s3055_s6 + $0x18] sm:$0xff] }
 0x464   :  { %v481_v16 = vadd.f32 %v480_v15, %v405_v62  ;;  %v494_v19 = vpop.f32.mrf.mxu2  ;;  %791 = vmatmul.bf16.vlgmr.msra.gmra.mxu1 %v519_v10  ;;  %v2211_v10 = vld [vmem:[%s3055_s6 + $0x10] sm:$0xff]  ;;  %v1912_v15 = vld [vmem:[%s3029_s8 + $0x38] sm:$0xff] }
 0x465   :  { %v495_v22 = vadd.f32 %v494_v19, %v406_v13  ;;  %833 = vmatmul.bf16.vlgmr.msrb.gmra.mxu0 %v522_v12  ;;  %917 = vmatpush.bf16.msrb.mxu1 %v2212_v14 }
 0x466   :  { %v516_v24 = vmax.f32 %v481_v16, 0.0  ;;  %v1911_v16 = vld [vmem:[%s3029_s8 + $0x30] sm:$0xff]  ;;  %973 = vmatpush.msra.mxu2 %v1912_v15 }
 0x467   :  { %v517_v28 = vmax.f32 %v495_v22, 0.0  ;;  %v1910_v22 = vld [vmem:[%s3029_s8 + $0x28] sm:$0xff] }
 0x468   :  { %v520_v29 = vpack.c.bf16 %v516_v24, %v512_v23  ;;  %974 = vmatpush.msra.mxu2 %v1911_v16  ;;  %v1909_v24 = vld [vmem:[%s3029_s8 + $0x20] sm:$0xff] }
 0x469   :  { %v521_v30 = vpack.c.bf16 %v517_v28, %v513_v26  ;;  %918 = vmatpush.bf16.msrb.mxu1 %v2211_v10 }
 0x46a   :  { %805 = vmatmul.bf16.vlgmr.msra.gmra.mxu3 %v520_v29  ;;  %975 = vmatpush.msra.mxu2 %v1910_v22 }
 0x46b   :  { %819 = vmatmul.bf16.vlgmr.msrb.gmra.mxu2 %v521_v30 }
 0x46c   :  { %976 = vmatpush.msra.mxu2 %v1909_v24 }
 0x4e1   :  { %v792_v33 = vpop.f32.mrf.mxu1 }
 0x4e2   :  { %v793_v8 = vadd.f32 %v2278_v7, %v792_v33  ;;  %v834_v37 = vpop.f32.mrf.mxu0 }
 0x4e9   :  { %v794_v38 = vpop.f32.mrf.mxu1 }
 0x4ea   :  { %v795_v40 = vadd.f32 %v2278_v7, %v794_v38  ;;  %v836_v48 = vpop.f32.mrf.mxu0 }
 0x4ed   :  { %v806_v34 = vpop.f32.mrf.mxu3 }
 0x4ee   :  { %v807_v35 = vadd.f32 %v806_v34, %v793_v8  ;;  %v820_v36 = vpop.f32.mrf.mxu2  ;;  %v2279_v8 = vld [vmem:[%s3040_s16] ss:$0 sm:$0xff] }
 0x4f0   :  { %v821_v39 = vadd.f32 %v820_v36, %v807_v35 }
 0x4f2   :  { %v835_v43 = vadd.f32 %v834_v37, %v821_v39  ;;  %v2280_v37 = vld [vmem:[%s3041_s17] ss:$0 sm:$0xff] }
 0x4f4   :  { %v839_v49 = vadd.f32 %v835_v43, %v2668_v31 }
 0x4f5   :  { %v808_v42 = vpop.f32.mrf.mxu3 }
 0x4f6   :  { %v809_v44 = vadd.f32 %v808_v42, %v795_v40  ;;  %v822_v45 = vpop.f32.mrf.mxu2  ;;  %v841_v52 = vsel %vm123_vm2, %v839_v49, 0.0 }
 0x4f8   :  { %v823_v46 = vadd.f32 %v822_v45, %v809_v44 }
 0x4fa   :  { %v837_v50 = vadd.f32 %v836_v48, %v823_v46 }
 0x4fc   :  { %v840_v51 = vadd.f32 %v837_v50, %v2670_v32 }
 0x4fe   :  { %v842_v53 = vsel %vm123_vm2, %v840_v51, 0.0 }
 0x4ff   :  { %v843_v63 = vadd.f32 %v842_v53, %v841_v52 }
 0x501   :  { %v844_v55 = vrot.slane %v843_v63, 4 }
 0x503   :  { %v845_v56 = vadd.f32 %v844_v55, %v843_v63 }
 0x505   :  { %v846_v57 = vrot.slane %v845_v56, 2 }
 0x507   :  { %v847_v58 = vadd.f32 %v846_v57, %v845_v56 }
 0x509   :  { %v848_v59 = vrot.slane %v847_v58, 1 }
 0x50b   :  { %v849_v60 = vadd.f32 %v848_v59, %v847_v58 }
 0x50d   :  { %v850_v61 = vmul.f32 %v849_v60, %v2556_v5 }
 0x50f   :  { %v851_v62 = vsub.f32 %v839_v49, %v850_v61  ;;  %v852_v1 = vsub.f32 %v840_v51, %v850_v61  ;;  %v1905_v51 = vld [vmem:[%s3031_s7 + $0x2] sm:$0x3] }
 0x511   :  { %v853_v2 = vmul.f32 %v851_v62, %v851_v62  ;;  %v854_v31 = vmul.f32 %v852_v1, %v852_v1 }
 0x513   :  { %v855_v13 = vsel %vm123_vm2, %v853_v2, 0.0  ;;  %v856_v32 = vsel %vm123_vm2, %v854_v31, 0.0 }
 0x514   :  { %v857_v0 = vadd.f32 %v856_v32, %v855_v13 }
 0x516   :  { %v858_v3 = vrot.slane %v857_v0, 4 }
 0x518   :  { %v859_v4 = vadd.f32 %v858_v3, %v857_v0 }
 0x51a   :  { %v860_v6 = vrot.slane %v859_v4, 2 }
 0x51c   :  { %v861_v9 = vadd.f32 %v860_v6, %v859_v4 }
 0x51e   :  { %v862_v11 = vrot.slane %v861_v9, 1 }
 0x520   :  { %v863_v12 = vadd.f32 %v862_v11, %v861_v9 }
 0x522   :  { %v864_v19 = vmul.f32 %v863_v12, %v2556_v5 }
 0x524   :  { %v865_v23 = vadd.f32 1e-05, %v864_v19 }
 0x526   :  { %2304 = vrsqrt.f32 %v865_v23  ;;  %vm872_vm13 = vweird.f32 %v865_v23 }
 0x52c   :  { %v2305_v26 = vpop.eup %2304 }
 0x52d   :  { %v867_v28 = vmul.f32 %v2305_v26, %v865_v23  ;;  %vm873_vm12 = vweird.f32 %v2305_v26 }
 0x52e   :  { %vm874_vm14 = vmor %vm872_vm13, %vm873_vm12 }
 0x52f   :  { %v868_v29 = vmul.f32 %v2305_v26, %v867_v28 }
 0x531   :  { %v869_v30 = vmul.f32 0.5, %v868_v29 }
 0x533   :  { %v870_v33 = vsub.f32 1.5, %v869_v30 }
 0x535   :  { %v871_v7 = vmul.f32 %v2305_v26, %v870_v33 }
 0x537   :  { %v875_v34 = vsel %vm874_vm14, %v2305_v26, %v871_v7 }
 0x538   :  { %v876_v35 = vmul.f32 %v875_v34, %v851_v62  ;;  %v877_v36 = vmul.f32 %v875_v34, %v852_v1 }
 0x53a   :  { %v882_v38 = vmul.f32 %v2279_v8, %v876_v35  ;;  %v883_v39 = vmul.f32 %v2279_v8, %v877_v36 }
 0x53c   :  { %v2772_v40 = vadd.f32 %v2280_v37, %v883_v39  ;;  %v2774_v42 = vadd.f32 %v2280_v37, %v882_v38 }
 0x53e   :  { %v890_v43 = vpack.c.bf16 %v2772_v40, %v2774_v42 }
 0x540   :  { %1904 = vmatmul.msk.bf16.vlgmr.msrb.gmra.mxu1 %vm123_vm2, %v890_v43 }
 0x5bd   :  { %v920_v44 = vpop.f32.mrf.mxu1 }
 0x5be   :  { %1913 = vmatmul.msk.f32.vlgmr.msra.gmra.mxu2 %vm123_vm2, %v920_v44  ;;  %v1061_v46 = vmul.f32 %v920_v44, %v2475_v20  ;;  %v1059_v52 = vmul.f32 %v920_v44, %v2494_v27 }
 0x5c5   :  { %v922_v45 = vpop.f32.mrf.mxu1 }
 0x5c6   :  { %v1062_v48 = vmul.f32 %v922_v45, %v2480_v21  ;;  %1906 = vmatpush.xpose.msk.msrb.mxu3 %vm123_vm2, %v922_v45  ;;  %1914 = vmatmul.msk.f32.gmra.mxu2 %vm123_vm2, %v922_v45  ;;  %v1060_v50 = vmul.f32 %v922_v45, %v2489_v25 }
 0x5c8   :  { %v1064_v49 = vpack.c.bf16 %v1062_v48, %v1061_v46  ;;  %v1063_v53 = vpack.c.bf16 %v1060_v50, %v1059_v52 }
 0x5ca   :  { %1907 = vmatpush.xpose.msk.msrb.mxu3 %vm123_vm2, %v920_v44 }
 0x5cd   :  { %1908 = vmatmul.msk.f32.vlgmr.msrb.gmra.mxu3 %vm123_vm2, %v1905_v51 }
 0x5ce   :  { %1074 = vmatpush.bf16.msra.mxu3 %v1064_v49 }
 0x5d2   :  { %1075 = vmatpush.bf16.msra.mxu3 %v1063_v53 }
 0x641   :  { %v978_v20 = vpop.f32.mrf.mxu2 }
 0x642   :  { %986 = vperm.xlu1 %2260, %v978_v20   ;;  %1018 = vperm.xlu2 %2267, %v978_v20   ;;  %v2281_v20 = vld [vmem:[%s3057_s21 + $0x1] ss:$0 sm:$0xff] }
 0x649   :  { %v981_v21 = vpop.f32.mrf.mxu2 }
 0x64a   :  { %2268 = vset.pattern.permute.xlu2 %v2323_v18  ;;  %1022 = vperm.xlu0 %2259, %v981_v21  }
 0x64b   :  { %991 = vperm.xlu2 %2268, %v981_v21  }
 0x650   :  { %v953_v25 = vpop.f32.mrf.mxu3 }
 0x651   :  { %v1025_v63 = vperm.slane %v953_v25, 1  ;;  %v994_v58 = vperm.slane %v953_v25, 0 }
 0x69c   :  { %v1019_v55 = vpop.permute.xlu2 %1018 }
 0x69d   :  { %v1026_v56 = vadd.f32 %v1025_v63, %v1019_v55 }
 0x69f   :  { %vm1028_vm15 = vcmp.gt.f32.partialorder %v1026_v56, 0.0  ;;  %v1030_v57 = vmul.f32 0.2, %v1026_v56 }
 0x6a1   :  { %v1032_v27 = vsel %vm1028_vm15, %v1026_v56, %v1030_v57 }
 0x6a2   :  { %v1034_v59 = vadd.f32 %v1032_v27, %v2506_v41  ;;  %v1108_v27 = vadd.f32 %v2281_v20, %v2772_v40 }
 0x6a4   :  { %v1036_v60 = vsel %vm219_vm5, %v1034_v59, -inf }
 0x6a5   :  { %v992_v61 = vpop.permute.xlu2 %991  ;;  %1037 = vmax.xlane.f32.xlu2 %v1036_v60 }
 0x6a6   :  { %v996_v62 = vadd.f32 %v994_v58, %v992_v61 }
 0x6a8   :  { %vm998_vm0 = vcmp.gt.f32.partialorder %v996_v62, 0.0  ;;  %v1000_v1 = vmul.f32 0.2, %v996_v62 }
 0x6aa   :  { %v1002_v18 = vsel %vm998_vm0, %v996_v62, %v1000_v1 }
 0x6ab   :  { %v1004_v2 = vadd.f32 %v1002_v18, %v2515_v54 }
 0x6ad   :  { %v1008_v31 = vsel %vm219_vm5, %v1004_v2, -inf }
 0x6ae   :  { %1009 = vmax.xlane.f32.xlu2 %v1008_v31 }
 0x6b4   :  { %v987_v13 = vpop.permute.xlu1 %986 }
 0x6b5   :  { %v995_v32 = vadd.f32 %v994_v58, %v987_v13 }
 0x6b7   :  { %vm997_vm1 = vcmp.gt.f32.partialorder %v995_v32, 0.0  ;;  %v999_v0 = vmul.f32 0.2, %v995_v32 }
 0x6b9   :  { %v1001_v3 = vsel %vm997_vm1, %v995_v32, %v999_v0 }
 0x6ba   :  { %v1003_v4 = vadd.f32 %v1001_v3, %v2506_v41 }
 0x6bc   :  { %v1023_v14 = vpop.permute.xlu0 %1022  ;;  %v1005_v6 = vsel %vm219_vm5, %v1003_v4, -inf }
 0x6bd   :  { %v1027_v9 = vadd.f32 %v1025_v63, %v1023_v14  ;;  %1006 = vmax.xlane.f32.xlu1 %v1005_v6  ;;  %v1107_v63 = vadd.f32 %v2281_v20, %v2774_v42  ;;  %v2251_v20 = vld [vmem:[%s3037_s14 + $0x1f0] sm:$0xff] }
 0x6bf   :  { %vm1029_vm3 = vcmp.gt.f32.partialorder %v1027_v9, 0.0  ;;  %v1031_v10 = vmul.f32 0.2, %v1027_v9 }
 0x6c1   :  { %v1033_v11 = vsel %vm1029_vm3, %v1027_v9, %v1031_v10  ;;  %v2217_v9 = vld [vmem:[%s3036_s12 + $0x64] sm:$0xf]  ;;  %v1949_v10 = vld [vmem:[%s3036_s12 + $0x70] sm:$0xf0] }
 0x6c2   :  { %v1035_v12 = vadd.f32 %v1033_v11, %v2515_v54  ;;  %v1955_v11 = vld [vmem:[%s3036_s12 + $0x68] sm:$0xf] }
 0x6c4   :  { %v1039_v15 = vsel %vm219_vm5, %v1035_v12, -inf }
 0x6c5   :  { %1040 = vmax.xlane.f32.xlu0 %v1039_v15  ;;  %v1952_v15 = vor.u32 %v2217_v9, %v1949_v10  ;;  %v2233_v9 = vld [vmem:[%s3037_s14 + $0x160] sm:$0xff] }
 0x6c6   :  { %v2241_v10 = vld [vmem:[%s3037_s14 + $0x1a0] sm:$0xff] }
 0x6c7   :  { %1248 = vmatpush.bf16.msrb.mxu2 %v1952_v15  ;;  %v2232_v15 = vld [vmem:[%s3037_s14 + $0x158] sm:$0xff] }
 0x718   :  { %v1038_v16 = vpop.xlane.xlu2 %1037 }
 0x719   :  { %v1042_v19 = vsub.f32 %v1034_v59, %v1038_v16  ;;  %v2220_v16 = vld [vmem:[%s3036_s12 + $0x74] sm:$0xf0] }
 0x71b   :  { %v1044_v22 = vmul.f32 1.442695, %v1042_v19  ;;  %v1947_v19 = vld [vmem:[%s3036_s12 + $0x60] sm:$0xf] }
 0x71d   :  { %2306 = vpow2.f32 %v1044_v22  ;;  %v1956_v22 = vor.u32 %v2220_v16, %v1955_v11  ;;  %v2223_v11 = vld [vmem:[%s3037_s14 + $0x110] sm:$0xff]  ;;  %v2240_v16 = vld [vmem:[%s3037_s14 + $0x198] sm:$0xff] }
 0x71f   :  { %1262 = vmatpush.bf16.msrb.mxu3 %v1956_v22  ;;  %v2246_v22 = vld [vmem:[%s3037_s14 + $0x1c8] sm:$0xff] }
 0x721   :  { %v1010_v30 = vpop.xlane.xlu2 %1009 }
 0x722   :  { %v1012_v7 = vsub.f32 %v1004_v2, %v1010_v30  ;;  %v2213_v30 = vld [vmem:[%s3036_s12 + $0x44] sm:$0xf] }
 0x723   :  { %v2307_v41 = vpop.eup %2306 }
 0x724   :  { %v1015_v8 = vmul.f32 1.442695, %v1012_v7  ;;  %v1939_v7 = vld [vmem:[%s3036_s12 + $0x48] sm:$0xf] }
 0x730   :  { %v1007_v33 = vpop.xlane.xlu1 %1006 }
 0x731   :  { %v1011_v54 = vsub.f32 %v1003_v4, %v1007_v33  ;;  %v1933_v33 = vld [vmem:[%s3036_s12 + $0x50] sm:$0xf0] }
 0x733   :  { %v1013_v34 = vmul.f32 1.442695, %v1011_v54 }
 0x738   :  { %v1041_v23 = vpop.xlane.xlu0 %1040 }
 0x739   :  { %v1043_v24 = vsub.f32 %v1035_v12, %v1041_v23  ;;  %v2219_v23 = vld [vmem:[%s3036_s12 + $0x6c] sm:$0xf0] }
 0x73b   :  { %v1046_v26 = vmul.f32 1.442695, %v1043_v24  ;;  %v2218_v24 = vld [vmem:[%s3036_s12 + $0x6c] sm:$0xf] }
 0x73d   :  { %2308 = vpow2.f32 %v1046_v26  ;;  %v1957_v26 = vld [vmem:[%s3036_s12 + $0x78] sm:$0xf0] }
 0x73e   :  { %2310 = vpow2.f32 %v1015_v8  ;;  %v1936_v8 = vor.u32 %v2213_v30, %v1933_v33  ;;  %v2229_v30 = vld [vmem:[%s3037_s14 + $0x140] sm:$0xff] }
 0x73f   :  { %2312 = vpow2.f32 %v1013_v34  ;;  %v2216_v34 = vld [vmem:[%s3036_s12 + $0x54] sm:$0xf0]  ;;  %v2237_v33 = vld [vmem:[%s3037_s14 + $0x180] sm:$0xff] }
 0x740   :  { %1249 = vmatpush.bf16.msrb.mxu2 %v1936_v8 }
 0x743   :  { %v2309_v28 = vpop.eup %2308 }
 0x744   :  { %v2269_v29 = vpack.i.bf16 %v2309_v28, %v2307_v41  ;;  %v2311_v36 = vpop.eup %2310  ;;  %v1948_v28 = vor.u32 %v2219_v23, %v1947_v19  ;;  %v2222_v19 = vld [vmem:[%s3037_s14 + $0x108] sm:$0xff]  ;;  %v2231_v23 = vld [vmem:[%s3037_s14 + $0x150] sm:$0xff] }
 0x745   :  { %v2313_v39 = vpop.eup %2312 }
 0x746   :  { %2270 = vrot.lane.b32.xlu0 %v2269_v29, %s2324_s1  ;;  %v1960_v29 = vor.u32 %v2218_v24, %v1957_v26  ;;  %1234 = vmatpush.bf16.msra.mxu1 %v1948_v28  ;;  %v2239_v24 = vld [vmem:[%s3037_s14 + $0x190] sm:$0xff]  ;;  %v2221_v26 = vld [vmem:[%s3037_s14 + $0x100] sm:$0xff]  ;;  %v2230_v28 = vld [vmem:[%s3037_s14 + $0x148] sm:$0xff] }
 0x748   :  { %1276 = vmatpush.bf16.msrb.mxu0 %v1960_v29  ;;  %v2238_v29 = vld [vmem:[%s3037_s14 + $0x188] sm:$0xff] }
 0x7b8   :  { %v2271_v35 = vpop.permute.xlu0 %2270 }
 0x7b9   :  { %v2273_v37 = vunpack.i.h.bf16 %v2271_v35  ;;  %v2272_v38 = vunpack.i.l.bf16 %v2271_v35  ;;  %v1931_v35 = vld [vmem:[%s3036_s12 + $0x40] sm:$0xf] }
 0x7bb   :  { %v1056_v43 = vsel %vm219_vm5, %v2313_v39, %v2272_v38  ;;  %v1057_v44 = vsel %vm219_vm5, %v2311_v36, %v2273_v37  ;;  %v2215_v36 = vld [vmem:[%s3036_s12 + $0x4c] sm:$0xf0]  ;;  %v1940_v37 = vor.u32 %v2216_v34, %v1939_v7  ;;  %v2214_v39 = vld [vmem:[%s3036_s12 + $0x4c] sm:$0xf]  ;;  %v1928_v7 = vld [vmem:[%s3039_s13 + $0x4] sm:$0xf] }
 0x7bc   :  { %v1058_v45 = vpack.c.bf16 %v1057_v44, %v1056_v43  ;;  %v1932_v38 = vor.u32 %v2215_v36, %v1931_v35  ;;  %v1941_v43 = vld [vmem:[%s3036_s12 + $0x58] sm:$0xf0]  ;;  %v1177_v34 = vperm.slane %v1928_v7, 0  ;;  %v1180_v35 = vperm.slane %v1928_v7, 3 }
 0x7bd   :  { %1263 = vmatpush.bf16.msrb.mxu3 %v1940_v37 }
 0x7be   :  { %1915 = vmatmul.msk.bf16.vlgmr.msra.gmra.mxu3 %vm123_vm2, %v1058_v45  ;;  %1916 = vmatmul.msk.bf16.vlgmr.msra.gmra.mxu0 %vm123_vm2, %v1058_v45  ;;  %v1944_v45 = vor.u32 %v2214_v39, %v1941_v43 }
 0x7bf   :  { %1235 = vmatpush.bf16.msra.mxu1 %v1932_v38 }
 0x7c0   :  { %1277 = vmatpush.bf16.msrb.mxu0 %v1944_v45 }
 0x83b   :  { %v1091_v46 = vpop.f32.mrf.mxu0 }
 0x83c   :  { %v1096_v48 = vmax.f32 %v1091_v46, 1e-20 }
 0x83e   :  { %2314 = vrcp.f32 %v1096_v48  ;;  %v2228_v48 = vld [vmem:[%s3037_s14 + $0x138] sm:$0xff] }
 0x83f   :  { %1558 = vmatpush.bf16.msrb.mxu1 %v2228_v48  ;;  %v1179_v48 = vperm.slane %v1928_v7, 2 }
 0x841   :  { %v1077_v51 = vpop.f32.mrf.mxu3 }
 0x843   :  { %v1093_v49 = vpop.f32.mrf.mxu0 }
 0x844   :  { %v2315_v50 = vpop.eup %2314  ;;  %v1097_v52 = vmax.f32 %v1093_v49, 1e-20  ;;  %v2252_v49 = vld [vmem:[%s3037_s14 + $0x1f8] sm:$0xff] }
 0x845   :  { %v1100_v53 = vmul.f32 %v2315_v50, %v2543_v17  ;;  %1600 = vmatpush.bf16.msra.mxu0 %v2252_v49 }
 0x846   :  { %2316 = vrcp.f32 %v1097_v52  ;;  %v2244_v52 = vld [vmem:[%s3037_s14 + $0x1b8] sm:$0xff] }
 0x847   :  { %v1109_v21 = vmul.f32 %v1100_v53, %v1077_v51  ;;  %v2236_v51 = vld [vmem:[%s3037_s14 + $0x178] sm:$0xff]  ;;  %v2227_v53 = vld [vmem:[%s3037_s14 + $0x130] sm:$0xff]  ;;  %1586 = vmatpush.bf16.msra.mxu3 %v2244_v52 }
 0x848   :  { %1572 = vmatpush.bf16.msra.mxu2 %v2236_v51  ;;  %1559 = vmatpush.bf16.msrb.mxu1 %v2227_v53 }
 0x849   :  { %v1079_v56 = vpop.f32.mrf.mxu3  ;;  %v1111_v57 = vadd.f32 %v1109_v21, %v1107_v63  ;;  %v2243_v63 = vld [vmem:[%s3037_s14 + $0x1b0] sm:$0xff]  ;;  %1601 = vmatpush.bf16.msra.mxu0 %v2251_v20 }
 0x84b   :  { %v1113_v60 = vsel %vm123_vm2, %v1111_v57, 0.0  ;;  %1587 = vmatpush.bf16.msra.mxu3 %v2243_v63 }
 0x84c   :  { %v2317_v25 = vpop.eup %2316 }
 0x84d   :  { %v1101_v55 = vmul.f32 %v2317_v25, %v2549_v47  ;;  %v2235_v25 = vld [vmem:[%s3037_s14 + $0x170] sm:$0xff] }
 0x84e   :  { %1573 = vmatpush.bf16.msra.mxu2 %v2235_v25 }
 0x84f   :  { %v1110_v58 = vmul.f32 %v1101_v55, %v1079_v56  ;;  %v2226_v55 = vld [vmem:[%s3037_s14 + $0x128] sm:$0xff] }
 0x850   :  { %v2250_v56 = vld [vmem:[%s3037_s14 + $0x1e8] sm:$0xff]  ;;  %1560 = vmatpush.bf16.msrb.mxu1 %v2226_v55 }
 0x851   :  { %v1112_v59 = vadd.f32 %v1110_v58, %v1108_v27  ;;  %v2242_v27 = vld [vmem:[%s3037_s14 + $0x1a8] sm:$0xff]  ;;  %1602 = vmatpush.bf16.msra.mxu0 %v2250_v56  ;;  %v2225_v58 = vld [vmem:[%s3037_s14 + $0x120] sm:$0xff] }
 0x852   :  { %1588 = vmatpush.bf16.msra.mxu3 %v2242_v27 }
 0x853   :  { %v1114_v17 = vsel %vm123_vm2, %v1112_v59, 0.0 }
 0x854   :  { %v1115_v61 = vadd.f32 %v1114_v17, %v1113_v60  ;;  %1561 = vmatpush.bf16.msrb.mxu1 %v2225_v58 }
 0x856   :  { %v1116_v62 = vrot.slane %v1115_v61, 4  ;;  %1589 = vmatpush.bf16.msra.mxu3 %v2241_v10 }
 0x858   :  { %v1117_v1 = vadd.f32 %v1116_v62, %v1115_v61 }
 0x85a   :  { %v1118_v18 = vrot.slane %v1117_v1, 2  ;;  %1590 = vmatpush.bf16.msra.mxu3 %v2240_v16 }
 0x85c   :  { %v1119_v2 = vadd.f32 %v1118_v18, %v1117_v1 }
 0x85e   :  { %v1120_v31 = vrot.slane %v1119_v2, 1  ;;  %1591 = vmatpush.bf16.msra.mxu3 %v2239_v24 }
 0x860   :  { %v1121_v13 = vadd.f32 %v1120_v31, %v1119_v2  ;;  %v2282_v2 = vld [vmem:[%s3034_s10 + $0x1] ss:$0 sm:$0xff] }
 0x862   :  { %v1122_v42 = vmul.f32 %v1121_v13, %v2556_v5  ;;  %1592 = vmatpush.bf16.msra.mxu3 %v2238_v29 }
 0x864   :  { %v2815_v47 = vsub.f32 %v1111_v57, %v1122_v42  ;;  %v2817_v32 = vsub.f32 %v1112_v59, %v1122_v42  ;;  %v2234_v57 = vld [vmem:[%s3037_s14 + $0x168] sm:$0xff]  ;;  %v2249_v59 = vld [vmem:[%s3037_s14 + $0x1e0] sm:$0xff] }
 0x865   :  { %1574 = vmatpush.bf16.msra.mxu2 %v2234_v57  ;;  %1603 = vmatpush.bf16.msra.mxu0 %v2249_v59 }
 0x866   :  { %v1125_v40 = vmul.f32 %v2815_v47, %v2815_v47  ;;  %v1126_v0 = vmul.f32 %v2817_v32, %v2817_v32  ;;  %1593 = vmatpush.bf16.msra.mxu3 %v2237_v33 }
 0x868   :  { %v1127_v3 = vsel %vm123_vm2, %v1125_v40, 0.0  ;;  %v1128_v4 = vsel %vm123_vm2, %v1126_v0, 0.0  ;;  %v2283_v40 = vld [vmem:[%s3035_s11 + $0x1] ss:$0 sm:$0xff] }
 0x869   :  { %v1129_v14 = vadd.f32 %v1128_v4, %v1127_v3  ;;  %1575 = vmatpush.bf16.msra.mxu2 %v2233_v9 }
 0x86b   :  { %v1130_v6 = vrot.slane %v1129_v14, 4 }
 0x86d   :  { %v1131_v12 = vadd.f32 %v1130_v6, %v1129_v14  ;;  %1576 = vmatpush.bf16.msra.mxu2 %v2232_v15 }
 0x86f   :  { %v1132_v41 = vrot.slane %v1131_v12, 2 }
 0x871   :  { %v1133_v54 = vadd.f32 %v1132_v41, %v1131_v12  ;;  %v2247_v12 = vld [vmem:[%s3037_s14 + $0x1d0] sm:$0xff]  ;;  %1577 = vmatpush.bf16.msra.mxu2 %v2231_v23  ;;  %v2245_v41 = vld [vmem:[%s3037_s14 + $0x1c0] sm:$0xff] }
 0x873   :  { %v1134_v44 = vrot.slane %v1133_v54, 1 }
 0x875   :  { %v1135_v46 = vadd.f32 %v1134_v44, %v1133_v54  ;;  %1578 = vmatpush.bf16.msra.mxu2 %v2230_v28  ;;  %v1178_v44 = vperm.slane %v1928_v7, 1 }
 0x877   :  { %v1136_v50 = vmul.f32 %v1135_v46, %v2556_v5 }
 0x879   :  { %v1137_v21 = vadd.f32 1e-05, %v1136_v50  ;;  %1579 = vmatpush.bf16.msra.mxu2 %v2229_v30 }
 0x87b   :  { %2318 = vrsqrt.f32 %v1137_v21  ;;  %vm1144_vm5 = vweird.f32 %v1137_v21 }
 0x881   :  { %v2319_v60 = vpop.eup %2318 }
 0x882   :  { %v1139_v17 = vmul.f32 %v2319_v60, %v1137_v21  ;;  %vm1145_vm4 = vweird.f32 %v2319_v60 }
 0x883   :  { %vm1146_vm6 = vmor %vm1144_vm5, %vm1145_vm4 }
 0x884   :  { %v1140_v61 = vmul.f32 %v2319_v60, %v1139_v17 }
 0x886   :  { %v1141_v62 = vmul.f32 0.5, %v1140_v61 }
 0x888   :  { %v1142_v1 = vsub.f32 1.5, %v1141_v62 }
 0x88a   :  { %v1143_v18 = vmul.f32 %v2319_v60, %v1142_v1 }
 0x88c   :  { %v1147_v31 = vsel %vm1146_vm6, %v2319_v60, %v1143_v18  ;;  %v2284_v18 = vld [vmem:[%s3038_s15 + $0x1] ss:$0 sm:$0xff] }
 0x88d   :  { %v1148_v13 = vmul.f32 %v1147_v31, %v2815_v47  ;;  %v1149_v42 = vmul.f32 %v1147_v31, %v2817_v32  ;;  %v2224_v47 = vld [vmem:[%s3037_s14 + $0x118] sm:$0xff] }
 0x88e   :  { %v2248_v32 = vld [vmem:[%s3037_s14 + $0x1d8] sm:$0xff]  ;;  %1562 = vmatpush.bf16.msrb.mxu1 %v2224_v47 }
 0x88f   :  { %v1155_v0 = vmul.f32 %v2282_v2, %v1148_v13  ;;  %v1156_v3 = vmul.f32 %v2282_v2, %v1149_v42  ;;  %1604 = vmatpush.bf16.msra.mxu0 %v2248_v32 }
 0x891   :  { %v2924_v4 = vadd.f32 %v2283_v40, %v1155_v0  ;;  %v2926_v14 = vadd.f32 %v2283_v40, %v1156_v3 }
 0x892   :  { %1563 = vmatpush.bf16.msrb.mxu1 %v2223_v11 }
 0x893   :  { %v1164_v6 = vpack.c.bf16 %v2926_v14, %v2924_v4  ;;  %1605 = vmatpush.bf16.msra.mxu0 %v2247_v12 }
 0x895   :  { %1961 = vmatmul.msk.bf16.vlgmr.msra.gmra.mxu1 %vm123_vm2, %v1164_v6  ;;  %1962 = vmatmul.msk.bf16.vlgmr.msrb.gmra.mxu2 %vm123_vm2, %v1164_v6 }
 0x896   :  { %1963 = vmatmul.msk.bf16.vlgmr.msrb.gmra.mxu3 %vm123_vm2, %v1164_v6  ;;  %1964 = vmatmul.msk.bf16.vlgmr.msrb.gmra.mxu0 %vm123_vm2, %v1164_v6 }
 0x897   :  { %1564 = vmatpush.bf16.msrb.mxu1 %v2222_v19  ;;  %1606 = vmatpush.bf16.msra.mxu0 %v2246_v22 }
 0x89b   :  { %1565 = vmatpush.bf16.msrb.mxu1 %v2221_v26  ;;  %1607 = vmatpush.bf16.msra.mxu0 %v2245_v41 }
 0x912   :  { %v1237_v54 = vpop.f32.mrf.mxu1 }
 0x913   :  { %v1279_v8 = vpop.f32.mrf.mxu0  ;;  %v1238_v37 = vadd.f32 %v1237_v54, %v1177_v34 }
 0x914   :  { %v1280_v39 = vadd.f32 %v1279_v8, %v1180_v35 }
 0x915   :  { %v1284_v50 = vmax.f32 %v1238_v37, 0.0 }
 0x916   :  { %v1287_v52 = vmax.f32 %v1280_v39, 0.0  ;;  %v2254_v39 = vld [vmem:[%s3043_s18 + $0x8] sm:$0xff] }
 0x917   :  { %1697 = vmatpush.bf16.msra.mxu1 %v2254_v39 }
 0x918   :  { %v1251_v36 = vpop.f32.mrf.mxu2 }
 0x919   :  { %v1265_v38 = vpop.f32.mrf.mxu3  ;;  %v1252_v20 = vadd.f32 %v1251_v36, %v1178_v44 }
 0x91a   :  { %v1239_v43 = vpop.f32.mrf.mxu1  ;;  %v1266_v25 = vadd.f32 %v1265_v38, %v1179_v48 }
 0x91b   :  { %v1240_v45 = vadd.f32 %v1239_v43, %v1177_v34  ;;  %v1281_v46 = vpop.f32.mrf.mxu0  ;;  %v1285_v58 = vmax.f32 %v1252_v20, 0.0 }
 0x91c   :  { %v1282_v49 = vadd.f32 %v1281_v46, %v1180_v35  ;;  %v1286_v60 = vmax.f32 %v1266_v25, 0.0 }
 0x91d   :  { %v1288_v51 = vmax.f32 %v1240_v45, 0.0  ;;  %v2253_v45 = vld [vmem:[%s3043_s18] sm:$0xff] }
 0x91e   :  { %v1291_v53 = vmax.f32 %v1282_v49, 0.0  ;;  %1698 = vmatpush.bf16.msra.mxu1 %v2253_v45 }
 0x91f   :  { %v1292_v21 = vpack.c.bf16 %v1288_v51, %v1284_v50 }
 0x920   :  { %v1295_v63 = vpack.c.bf16 %v1291_v53, %v1287_v52  ;;  %v1253_v55 = vpop.f32.mrf.mxu2 }
 0x921   :  { %v1254_v56 = vadd.f32 %v1253_v55, %v1178_v44  ;;  %v1267_v57 = vpop.f32.mrf.mxu3  ;;  %1566 = vmatmul.bf16.vlgmr.msrb.gmra.mxu1 %v1292_v21 }
 0x922   :  { %v1268_v27 = vadd.f32 %v1267_v57, %v1179_v48  ;;  %1608 = vmatmul.bf16.vlgmr.msra.gmra.mxu0 %v1295_v63  ;;  %v2285_v63 = vld [vmem:[%s3040_s16 + $0x1] ss:$0 sm:$0xff] }
 0x923   :  { %v1289_v59 = vmax.f32 %v1254_v56, 0.0 }
 0x924   :  { %v1290_v17 = vmax.f32 %v1268_v27, 0.0 }
 0x925   :  { %v1293_v61 = vpack.c.bf16 %v1289_v59, %v1285_v58 }
 0x926   :  { %v1294_v62 = vpack.c.bf16 %v1290_v17, %v1286_v60 }
 0x927   :  { %1580 = vmatmul.bf16.vlgmr.msra.gmra.mxu2 %v1293_v61  ;;  %v2287_v61 = vld [vmem:[%s3042_s19] ss:$0 sm:$0xff] }
 0x928   :  { %1594 = vmatmul.bf16.vlgmr.msra.gmra.mxu3 %v1294_v62 }
 0x99e   :  { %v1567_v1 = vpop.f32.mrf.mxu1 }
 0x99f   :  { %v1568_v2 = vadd.f32 %v2284_v18, %v1567_v1  ;;  %v1609_v40 = vpop.f32.mrf.mxu0 }
 0x9a6   :  { %v1569_v0 = vpop.f32.mrf.mxu1 }
 0x9a7   :  { %v1570_v6 = vadd.f32 %v2284_v18, %v1569_v0  ;;  %v1611_v12 = vpop.f32.mrf.mxu0 }
 0x9aa   :  { %v1581_v31 = vpop.f32.mrf.mxu2 }
 0x9ab   :  { %v1582_v13 = vadd.f32 %v1581_v31, %v1568_v2  ;;  %v1595_v42 = vpop.f32.mrf.mxu3 }
 0x9ad   :  { %v1596_v3 = vadd.f32 %v1595_v42, %v1582_v13 }
 0x9af   :  { %v1610_v32 = vadd.f32 %v1609_v40, %v1596_v3 }
 0x9b1   :  { %v1614_v15 = vadd.f32 %v1610_v32, %v2924_v4 }
 0x9b2   :  { %v1583_v47 = vpop.f32.mrf.mxu2 }
 0x9b3   :  { %v1584_v9 = vadd.f32 %v1583_v47, %v1570_v6  ;;  %v1597_v10 = vpop.f32.mrf.mxu3  ;;  %v1616_v22 = vsel %vm123_vm2, %v1614_v15, 0.0 }
 0x9b5   :  { %v1598_v11 = vadd.f32 %v1597_v10, %v1584_v9 }
 0x9b7   :  { %v1612_v16 = vadd.f32 %v1611_v12, %v1598_v11 }
 0x9b9   :  { %v1615_v19 = vadd.f32 %v1612_v16, %v2926_v14 }
 0x9bb   :  { %v1617_v23 = vsel %vm123_vm2, %v1615_v19, 0.0 }
 0x9bc   :  { %v1618_v24 = vadd.f32 %v1617_v23, %v1616_v22 }
 0x9be   :  { %v1619_v26 = vrot.slane %v1618_v24, 4 }
 0x9c0   :  { %v1620_v41 = vadd.f32 %v1619_v26, %v1618_v24 }
 0x9c2   :  { %v1621_v28 = vrot.slane %v1620_v41, 2 }
 0x9c4   :  { %v1622_v29 = vadd.f32 %v1621_v28, %v1620_v41 }
 0x9c6   :  { %v1623_v30 = vrot.slane %v1622_v29, 1 }
 0x9c8   :  { %v1624_v33 = vadd.f32 %v1623_v30, %v1622_v29 }
 0x9ca   :  { %v1625_v7 = vmul.f32 %v1624_v33, %v2556_v5 }
 0x9cc   :  { %v1626_v54 = vsub.f32 %v1614_v15, %v1625_v7  ;;  %v1627_v8 = vsub.f32 %v1615_v19, %v1625_v7 }
 0x9ce   :  { %v1628_v34 = vmul.f32 %v1626_v54, %v1626_v54  ;;  %v1629_v4 = vmul.f32 %v1627_v8, %v1627_v8 }
 0x9d0   :  { %v1630_v35 = vsel %vm123_vm2, %v1628_v34, 0.0  ;;  %v1631_v14 = vsel %vm123_vm2, %v1629_v4, 0.0 }
 0x9d1   :  { %v1632_v36 = vadd.f32 %v1631_v14, %v1630_v35 }
 0x9d3   :  { %v1633_v37 = vrot.slane %v1632_v36, 4 }
 0x9d5   :  { %v1634_v38 = vadd.f32 %v1633_v37, %v1632_v36 }
 0x9d7   :  { %v1635_v43 = vrot.slane %v1634_v38, 2 }
 0x9d9   :  { %v1636_v44 = vadd.f32 %v1635_v43, %v1634_v38 }
 0x9db   :  { %v1637_v46 = vrot.slane %v1636_v44, 1 }
 0x9dd   :  { %v1638_v48 = vadd.f32 %v1637_v46, %v1636_v44 }
 0x9df   :  { %v1639_v49 = vmul.f32 %v1638_v48, %v2556_v5  ;;  %v2286_v5 = vld [vmem:[%s3041_s17 + $0x1] ss:$0 sm:$0xff] }
 0x9e1   :  { %v1640_v50 = vadd.f32 1e-05, %v1639_v49 }
 0x9e3   :  { %2320 = vrsqrt.f32 %v1640_v50  ;;  %vm1647_vm8 = vweird.f32 %v1640_v50 }
 0x9e9   :  { %v2321_v51 = vpop.eup %2320 }
 0x9ea   :  { %v1642_v52 = vmul.f32 %v2321_v51, %v1640_v50  ;;  %vm1648_vm7 = vweird.f32 %v2321_v51 }
 0x9eb   :  { %vm1649_vm9 = vmor %vm1647_vm8, %vm1648_vm7 }
 0x9ec   :  { %v1643_v53 = vmul.f32 %v2321_v51, %v1642_v52 }
 0x9ee   :  { %v1644_v20 = vmul.f32 0.5, %v1643_v53 }
 0x9f0   :  { %v1645_v21 = vsub.f32 1.5, %v1644_v20 }
 0x9f2   :  { %v1646_v25 = vmul.f32 %v2321_v51, %v1645_v21 }
 0x9f4   :  { %v1650_v55 = vsel %vm1649_vm9, %v2321_v51, %v1646_v25 }
 0x9f5   :  { %v1651_v56 = vmul.f32 %v1650_v55, %v1626_v54  ;;  %v1652_v57 = vmul.f32 %v1650_v55, %v1627_v8 }
 0x9f7   :  { %v1658_v27 = vmul.f32 %v2285_v63, %v1651_v56  ;;  %v1659_v58 = vmul.f32 %v2285_v63, %v1652_v57 }
 0x9f9   :  { %v1666_v59 = vadd.f32 %v2286_v5, %v1659_v58  ;;  %v1665_v60 = vadd.f32 %v2286_v5, %v1658_v27 }
 0x9fb   :  { %v1667_v17 = vpack.c.bf16 %v1666_v59, %v1665_v60 }
 0x9fd   :  { %2168 = vmatmul.msk.bf16.vlgmr.msra.gmra.mxu1 %vm123_vm2, %v1667_v17 }
 0xa7a   :  { %v1700_v62 = vpop.f32.mrf.mxu1 }
 0xa7b   :  { %v1701_v1 = vadd.f32 %v2287_v61, %v1700_v62 }
 0xa7d   :  { %1705 = vst [vmem:[%s3044_s20] sm:$0xff] %v1701_v1 }
 0xa82   :  { %v1702_v18 = vpop.f32.mrf.mxu1 }
 0xa83   :  { %v1703_v2 = vadd.f32 %v2287_v61, %v1702_v18 }
 0xa85   :  { %1706 = vst [vmem:[%s3044_s20 + $0x8] sm:$0xff] %v1703_v2 }

</bundles_post_ra>
